<compile_context>
chip_gen: v5e
topology: v5e:2x2
jax: 0.10.0
libtpu: 0.0.40
codegen_flags: <defaults>
</compile_context>

<pallas_src>
import math
import functools

import jax
import jax.numpy as jnp
from jax.experimental import pallas as pl
from jax.experimental.pallas import tpu as pltpu


def _box_loss_kernel(geom_ref, pd_ref, box_ref, dfl_ref, *, dfl_ch):
    """One grid step == one lane-dense tile of anchors.

    geom_ref: (11, TR, 128) f32  rows = [pb_x1,pb_y1,pb_x2,pb_y2,
                                         tb_x1,tb_y1,tb_x2,tb_y2,
                                         anchor_x, anchor_y, weight(=sum(ts)*fg)]
    pd_ref:   (4*R, TR, 128) f32 DFL logits, side-major / bin-minor
    box_ref:  (1, 1, 128) f32    per-block lane-wise partial sum of box loss
    dfl_ref:  (1, 1, 128) f32    per-block lane-wise partial sum of dfl loss
    """
    eps = 1e-7

    b1_x1 = geom_ref[0]
    b1_y1 = geom_ref[1]
    b1_x2 = geom_ref[2]
    b1_y2 = geom_ref[3]
    b2_x1 = geom_ref[4]
    b2_y1 = geom_ref[5]
    b2_x2 = geom_ref[6]
    b2_y2 = geom_ref[7]
    ax = geom_ref[8]
    ay = geom_ref[9]
    wgt = geom_ref[10]            # target_scores.sum(-1) * fg  (0 on pad/bg rows)

    # ---------------- CIoU (compute_iou) ----------------
    w1, h1 = b1_x2 - b1_x1, b1_y2 - b1_y1 + eps
    w2, h2 = b2_x2 - b2_x1, b2_y2 - b2_y1 + eps
    inter = (jnp.maximum(jnp.minimum(b1_x2, b2_x2) - jnp.maximum(b1_x1, b2_x1), 0.0)
             * jnp.maximum(jnp.minimum(b1_y2, b2_y2) - jnp.maximum(b1_y1, b2_y1), 0.0))
    union = w1 * h1 + w2 * h2 - inter + eps
    iou = inter / union
    cw = jnp.maximum(b1_x2, b2_x2) - jnp.minimum(b1_x1, b2_x1)
    ch = jnp.maximum(b1_y2, b2_y2) - jnp.minimum(b1_y1, b2_y1)
    c2 = cw * cw + ch * ch + eps
    rho2 = ((b2_x1 + b2_x2 - b1_x1 - b1_x2) ** 2
            + (b2_y1 + b2_y2 - b1_y1 - b1_y2) ** 2) * 0.25
    # atan(x) == atan2(x, 1) for all real x (guaranteed Mosaic lowering).
    v = (4.0 / math.pi ** 2) * (jnp.arctan2(w2 / h2, 1.0)
                                - jnp.arctan2(w1 / h1, 1.0)) ** 2
    alpha = v / (v - iou + (1.0 + eps))      # torch computes alpha under no_grad;
    ciou = iou - (rho2 / c2 + v * alpha)     # forward value identical.
    box_per = (1.0 - ciou) * wgt             # (TR, 128)

    # ---------------- DFL loss ----------------
    R = dfl_ch + 1
    dfl_max = float(dfl_ch) - 0.01
    # side order matches torch cat((anchor - lt, rb - anchor), -1)
    sides = (
        jnp.clip(ax - b2_x1, 0.0, dfl_max),
        jnp.clip(ay - b2_y1, 0.0, dfl_max),
        jnp.clip(b2_x2 - ax, 0.0, dfl_max),
        jnp.clip(b2_y2 - ay, 0.0, dfl_max),
    )
    dfl_acc = jnp.zeros_like(wgt)
    for s in range(4):
        t = sides[s]
        tl = jnp.floor(t)                     # t >= 0, so floor == torch .long()
        wl = (tl + 1.0) - t
        wr = 1.0 - wl
        # max over the R bins (fully unrolled -> pure per-vreg VPU work)
        m = pd_ref[s * R]
        for r in range(1, R):
            m = jnp.maximum(m, pd_ref[s * R + r])
        esum = jnp.zeros_like(t)
        gsum = jnp.zeros_like(t)
        for r in range(R):
            lr = pd_ref[s * R + r]
            esum = esum + jnp.exp(lr - m)
            fr = float(r)
            coef = jnp.where(tl == fr, wl, jnp.where(tl + 1.0 == fr, wr, 0.0))
            gsum = gsum + lr * coef
        # CE(left)*wl + CE(right)*wr == logsumexp - (logit[tl]*wl + logit[tl+1]*wr)
        dfl_acc = dfl_acc + (m + jnp.log(esum)) - gsum
    dfl_per = dfl_acc * 0.25                  # mean over the 4 sides

    # Per-block partials: one sublane reduction per output, lane-dense store.
    box_ref[0] = jnp.sum(box_per, axis=0, keepdims=True)        # (1, 128)
    dfl_ref[0] = jnp.sum(dfl_per * wgt, axis=0, keepdims=True)  # (1, 128)


@functools.partial(jax.jit, static_argnames=("dfl_ch", "tile_n"))
def box_loss(pred_dist, pred_bboxes, anchor_points, target_bboxes,
             target_scores, target_scores_sum, fg_mask, *, dfl_ch, tile_n=2048):
    B, A, _ = pred_bboxes.shape
    R = dfl_ch + 1
    N = B * A
    f32 = jnp.float32

    # tile_n: multiple of 1024 (so sublane rows are a multiple of 8); clamp so
    # tiny inputs are not over-padded.
    tile_n = max(1024, (int(tile_n) // 1024) * 1024)
    tile_n = min(tile_n, ((N + 1023) // 1024) * 1024)
    n_pad = ((N + tile_n - 1) // tile_n) * tile_n
    rows = n_pad // 128
    tile_rows = tile_n // 128
    grid = (n_pad // tile_n,)
    G = grid[0]

    pb = pred_bboxes.reshape(N, 4).astype(f32)
    tb = target_bboxes.reshape(N, 4).astype(f32)
    ap = jnp.broadcast_to(anchor_points.astype(f32)[None], (B, A, 2)).reshape(N, 2)
    # Pre-folded weight: target_scores.sum(-1) * fg  (drops the (N,C) stream and
    # the fg mask from the kernel entirely; padded rows get weight 0).
    wgt = (target_scores.astype(f32).sum(-1) * fg_mask.astype(f32)).reshape(N, 1)

    feat = jnp.concatenate([pb, tb, ap, wgt], axis=-1)        # (N, 11)
    pd = pred_dist.reshape(N, 4 * R).astype(f32)              # (N, 4R)

    pad = n_pad - N
    if pad:
        feat = jnp.pad(feat, ((0, pad), (0, 0)))
        pd = jnp.pad(pd, ((0, pad), (0, 0)))

    # anchors -> lane axis (lane-dense layout)
    geom = feat.T.reshape(11, rows, 128)                      # (11, rows, 128)
    pdl = pd.T.reshape(4 * R, rows, 128)                      # (4R, rows, 128)

    kernel = functools.partial(_box_loss_kernel, dfl_ch=dfl_ch)
    box_p, dfl_p = pl.pallas_call(
        kernel,
        out_shape=(jax.ShapeDtypeStruct((G, 1, 128), f32),
                   jax.ShapeDtypeStruct((G, 1, 128), f32)),
        grid=grid,
        in_specs=[pl.BlockSpec((11, tile_rows, 128), lambda i: (0, i, 0)),
                  pl.BlockSpec((4 * R, tile_rows, 128), lambda i: (0, i, 0))],
        out_specs=(pl.BlockSpec((1, 1, 128), lambda i: (i, 0, 0)),
                   pl.BlockSpec((1, 1, 128), lambda i: (i, 0, 0))),
        compiler_params=pltpu.CompilerParams(
            dimension_semantics=("parallel",)),
    )(geom, pdl)

    tss = jnp.asarray(target_scores_sum, f32)
    return jnp.sum(box_p) / tss, jnp.sum(dfl_p) / tss


def _reference(pred_dist, pred_bboxes, anchor_points, target_bboxes,
               target_scores, target_scores_sum, fg_mask, dfl_ch):
    """Pure-JAX dense-masked reference (matches the torch forward)."""
    eps = 1e-7
    f32 = jnp.float32
    B, A, _ = pred_bboxes.shape
    R = dfl_ch + 1
    fg = fg_mask.astype(f32)[..., None]
    weight = target_scores.astype(f32).sum(-1, keepdims=True) * fg

    pb, tb = pred_bboxes.astype(f32), target_bboxes.astype(f32)
    b1_x1, b1_y1, b1_x2, b1_y2 = jnp.split(pb, 4, -1)
    b2_x1, b2_y1, b2_x2, b2_y2 = jnp.split(tb, 4, -1)
    w1, h1 = b1_x2 - b1_x1, b1_y2 - b1_y1 + eps
    w2, h2 = b2_x2 - b2_x1, b2_y2 - b2_y1 + eps
    inter = (jnp.maximum(jnp.minimum(b1_x2, b2_x2) - jnp.maximum(b1_x1, b2_x1), 0.0)
             * jnp.maximum(jnp.minimum(b1_y2, b2_y2) - jnp.maximum(b1_y1, b2_y1), 0.0))
    union = w1 * h1 + w2 * h2 - inter + eps
    iou = inter / union
    cw = jnp.maximum(b1_x2, b2_x2) - jnp.minimum(b1_x1, b2_x1)
    ch = jnp.maximum(b1_y2, b2_y2) - jnp.minimum(b1_y1, b2_y1)
    c2 = cw ** 2 + ch ** 2 + eps
    rho2 = ((b2_x1 + b2_x2 - b1_x1 - b1_x2) ** 2
            + (b2_y1 + b2_y2 - b1_y1 - b1_y2) ** 2) / 4
    v = 4 / math.pi ** 2 * (jnp.arctan2(w2 / h2, 1.0) - jnp.arctan2(w1 / h1, 1.0)) ** 2
    alpha = v / (v - iou + (1 + eps))
    ciou = iou - (rho2 / c2 + v * alpha)
    loss_box = jnp.sum((1.0 - ciou) * weight) / target_scores_sum

    ap = anchor_points.astype(f32)[None]
    a, b = tb[..., :2], tb[..., 2:]
    tgt = jnp.clip(jnp.concatenate([ap - a, b - ap], -1), 0, dfl_ch - 0.01)
    logits = pred_dist.astype(f32).reshape(B, A, 4, R)
    tl = jnp.floor(tgt)
    wl = tl + 1.0 - tgt
    wr = 1.0 - wl
    lse = jax.nn.logsumexp(logits, axis=-1)
    oh_l = jax.nn.one_hot(tl.astype(jnp.int32), R, dtype=f32)
    oh_r = jax.nn.one_hot(tl.astype(jnp.int32) + 1, R, dtype=f32)
    left = lse - jnp.sum(oh_l * logits, -1)
    right = lse - jnp.sum(oh_r * logits, -1)
    dfl = jnp.mean(left * wl + right * wr, axis=-1, keepdims=True)
    loss_dfl = jnp.sum(dfl * weight) / target_scores_sum
    return loss_box, loss_dfl


if __name__ == "__main__":
    key = jax.random.PRNGKey(0)
    B, A, C, dfl_ch = 2, 64, 4, 8
    R = dfl_ch + 1
    ks = jax.random.split(key, 6)

    anchor_points = jax.random.uniform(ks[0], (A, 2), jnp.float32, 1.0, 7.0)
    pred_dist = jax.random.normal(ks[1], (B, A, 4 * R), jnp.float32)

    def make_boxes(k):
        k1, k2 = jax.random.split(k)
        xy1 = jax.random.uniform(k1, (B, A, 2), jnp.float32, 0.0, 5.0)
        wh = jax.random.uniform(k2, (B, A, 2), jnp.float32, 0.5, 3.0)
        return jnp.concatenate([xy1, xy1 + wh], axis=-1)

    pred_bboxes = make_boxes(ks[2])
    target_bboxes = make_boxes(ks[3])
    target_scores = jax.random.uniform(ks[4], (B, A, C), jnp.float32)
    fg_mask = jax.random.bernoulli(ks[5], 0.5, (B, A))
    target_scores_sum = jnp.maximum(target_scores.sum(), 1.0)

    loss_box, loss_dfl = box_loss(pred_dist, pred_bboxes, anchor_points,
                                  target_bboxes, target_scores,
                                  target_scores_sum, fg_mask, dfl_ch=dfl_ch)
    jax.block_until_ready((loss_box, loss_dfl))

    ref_box, ref_dfl = _reference(pred_dist, pred_bboxes, anchor_points,
                                  target_bboxes, target_scores,
                                  target_scores_sum, fg_mask, dfl_ch)
    assert jnp.allclose(loss_box, ref_box, rtol=1e-4, atol=1e-4), (loss_box, ref_box)
    assert jnp.allclose(loss_dfl, ref_dfl, rtol=1e-4, atol=1e-4), (loss_dfl, ref_dfl)
    print("KERNEL_OK")
</pallas_src>

<mosaic_0001>
module attributes {stable_mosaic.version = 11 : i64} {
  func.func @_box_loss_kernel(%arg0: i32, %arg1: memref<11x8x128xf32, #tpu.memory_space<vmem>>, %arg2: memref<36x8x128xf32, #tpu.memory_space<vmem>>, %arg3: memref<1x1x128xf32, #tpu.memory_space<vmem>>, %arg4: memref<1x1x128xf32, #tpu.memory_space<vmem>>) attributes {dimension_semantics = [#tpu.dimension_semantics<parallel>], iteration_bounds = array<i64: 1>, scalar_prefetch = 0 : i64, scratch_operands = 0 : i64, tpu.core_type = #tpu.core_type<tc>, window_params = [{transform_indices = @transform_0, window_bounds = array<i64: 11, 8, 128>}, {transform_indices = @transform_1, window_bounds = array<i64: 36, 8, 128>}, {transform_indices = @transform_2, window_bounds = array<i64: 1, 1, 128>}, {transform_indices = @transform_3, window_bounds = array<i64: 1, 1, 128>}]} {
    %c0 = arith.constant 0 : index
    %c0_0 = arith.constant 0 : index
    %c0_1 = arith.constant 0 : index
    %0 = vector.load %arg1[%c0, %c0_0, %c0_1] : memref<11x8x128xf32, #tpu.memory_space<vmem>>, vector<1x8x128xf32>
    %1 = vector.shape_cast %0 : vector<1x8x128xf32> to vector<8x128xf32>
    %c1 = arith.constant 1 : index
    %c0_2 = arith.constant 0 : index
    %c0_3 = arith.constant 0 : index
    %2 = vector.load %arg1[%c1, %c0_2, %c0_3] : memref<11x8x128xf32, #tpu.memory_space<vmem>>, vector<1x8x128xf32>
    %3 = vector.shape_cast %2 : vector<1x8x128xf32> to vector<8x128xf32>
    %c2 = arith.constant 2 : index
    %c0_4 = arith.constant 0 : index
    %c0_5 = arith.constant 0 : index
    %4 = vector.load %arg1[%c2, %c0_4, %c0_5] : memref<11x8x128xf32, #tpu.memory_space<vmem>>, vector<1x8x128xf32>
    %5 = vector.shape_cast %4 : vector<1x8x128xf32> to vector<8x128xf32>
    %c3 = arith.constant 3 : index
    %c0_6 = arith.constant 0 : index
    %c0_7 = arith.constant 0 : index
    %6 = vector.load %arg1[%c3, %c0_6, %c0_7] : memref<11x8x128xf32, #tpu.memory_space<vmem>>, vector<1x8x128xf32>
    %7 = vector.shape_cast %6 : vector<1x8x128xf32> to vector<8x128xf32>
    %c4 = arith.constant 4 : index
    %c0_8 = arith.constant 0 : index
    %c0_9 = arith.constant 0 : index
    %8 = vector.load %arg1[%c4, %c0_8, %c0_9] : memref<11x8x128xf32, #tpu.memory_space<vmem>>, vector<1x8x128xf32>
    %9 = vector.shape_cast %8 : vector<1x8x128xf32> to vector<8x128xf32>
    %c5 = arith.constant 5 : index
    %c0_10 = arith.constant 0 : index
    %c0_11 = arith.constant 0 : index
    %10 = vector.load %arg1[%c5, %c0_10, %c0_11] : memref<11x8x128xf32, #tpu.memory_space<vmem>>, vector<1x8x128xf32>
    %11 = vector.shape_cast %10 : vector<1x8x128xf32> to vector<8x128xf32>
    %c6 = arith.constant 6 : index
    %c0_12 = arith.constant 0 : index
    %c0_13 = arith.constant 0 : index
    %12 = vector.load %arg1[%c6, %c0_12, %c0_13] : memref<11x8x128xf32, #tpu.memory_space<vmem>>, vector<1x8x128xf32>
    %13 = vector.shape_cast %12 : vector<1x8x128xf32> to vector<8x128xf32>
    %c7 = arith.constant 7 : index
    %c0_14 = arith.constant 0 : index
    %c0_15 = arith.constant 0 : index
    %14 = vector.load %arg1[%c7, %c0_14, %c0_15] : memref<11x8x128xf32, #tpu.memory_space<vmem>>, vector<1x8x128xf32>
    %15 = vector.shape_cast %14 : vector<1x8x128xf32> to vector<8x128xf32>
    %c8 = arith.constant 8 : index
    %c0_16 = arith.constant 0 : index
    %c0_17 = arith.constant 0 : index
    %16 = vector.load %arg1[%c8, %c0_16, %c0_17] : memref<11x8x128xf32, #tpu.memory_space<vmem>>, vector<1x8x128xf32>
    %17 = vector.shape_cast %16 : vector<1x8x128xf32> to vector<8x128xf32>
    %c9 = arith.constant 9 : index
    %c0_18 = arith.constant 0 : index
    %c0_19 = arith.constant 0 : index
    %18 = vector.load %arg1[%c9, %c0_18, %c0_19] : memref<11x8x128xf32, #tpu.memory_space<vmem>>, vector<1x8x128xf32>
    %19 = vector.shape_cast %18 : vector<1x8x128xf32> to vector<8x128xf32>
    %c10 = arith.constant 10 : index
    %c0_20 = arith.constant 0 : index
    %c0_21 = arith.constant 0 : index
    %20 = vector.load %arg1[%c10, %c0_20, %c0_21] : memref<11x8x128xf32, #tpu.memory_space<vmem>>, vector<1x8x128xf32>
    %21 = vector.shape_cast %20 : vector<1x8x128xf32> to vector<8x128xf32>
    %22 = arith.subf %5, %1 : vector<8x128xf32>
    %23 = arith.subf %7, %3 : vector<8x128xf32>
    %cst = arith.constant 1.000000e-07 : f32
    %24 = vector.broadcast %cst : f32 to vector<8x128xf32>
    %25 = arith.addf %23, %24 : vector<8x128xf32>
    %26 = arith.subf %13, %9 : vector<8x128xf32>
    %27 = arith.subf %15, %11 : vector<8x128xf32>
    %cst_22 = arith.constant 1.000000e-07 : f32
    %28 = vector.broadcast %cst_22 : f32 to vector<8x128xf32>
    %29 = arith.addf %27, %28 : vector<8x128xf32>
    %30 = arith.minimumf %5, %13 : vector<8x128xf32>
    %31 = arith.maximumf %1, %9 : vector<8x128xf32>
    %32 = arith.subf %30, %31 : vector<8x128xf32>
    %cst_23 = arith.constant 0.000000e+00 : f32
    %33 = vector.broadcast %cst_23 : f32 to vector<8x128xf32>
    %34 = arith.maximumf %32, %33 : vector<8x128xf32>
    %35 = arith.minimumf %7, %15 : vector<8x128xf32>
    %36 = arith.maximumf %3, %11 : vector<8x128xf32>
    %37 = arith.subf %35, %36 : vector<8x128xf32>
    %cst_24 = arith.constant 0.000000e+00 : f32
    %38 = vector.broadcast %cst_24 : f32 to vector<8x128xf32>
    %39 = arith.maximumf %37, %38 : vector<8x128xf32>
    %40 = arith.mulf %34, %39 : vector<8x128xf32>
    %41 = arith.mulf %22, %25 : vector<8x128xf32>
    %42 = arith.mulf %26, %29 : vector<8x128xf32>
    %43 = arith.addf %41, %42 : vector<8x128xf32>
    %44 = arith.subf %43, %40 : vector<8x128xf32>
    %cst_25 = arith.constant 1.000000e-07 : f32
    %45 = vector.broadcast %cst_25 : f32 to vector<8x128xf32>
    %46 = arith.addf %44, %45 : vector<8x128xf32>
    %47 = arith.divf %40, %46 : vector<8x128xf32>
    %48 = arith.maximumf %5, %13 : vector<8x128xf32>
    %49 = arith.minimumf %1, %9 : vector<8x128xf32>
    %50 = arith.subf %48, %49 : vector<8x128xf32>
    %51 = arith.maximumf %7, %15 : vector<8x128xf32>
    %52 = arith.minimumf %3, %11 : vector<8x128xf32>
    %53 = arith.subf %51, %52 : vector<8x128xf32>
    %54 = arith.mulf %50, %50 : vector<8x128xf32>
    %55 = arith.mulf %53, %53 : vector<8x128xf32>
    %56 = arith.addf %54, %55 : vector<8x128xf32>
    %cst_26 = arith.constant 1.000000e-07 : f32
    %57 = vector.broadcast %cst_26 : f32 to vector<8x128xf32>
    %58 = arith.addf %56, %57 : vector<8x128xf32>
    %59 = arith.addf %9, %13 : vector<8x128xf32>
    %60 = arith.subf %59, %1 : vector<8x128xf32>
    %61 = arith.subf %60, %5 : vector<8x128xf32>
    %62 = arith.mulf %61, %61 : vector<8x128xf32>
    %63 = arith.addf %11, %15 : vector<8x128xf32>
    %64 = arith.subf %63, %3 : vector<8x128xf32>
    %65 = arith.subf %64, %7 : vector<8x128xf32>
    %66 = arith.mulf %65, %65 : vector<8x128xf32>
    %67 = arith.addf %62, %66 : vector<8x128xf32>
    %cst_27 = arith.constant 2.500000e-01 : f32
    %68 = vector.broadcast %cst_27 : f32 to vector<8x128xf32>
    %69 = arith.mulf %67, %68 : vector<8x128xf32>
    %70 = arith.divf %26, %29 : vector<8x128xf32>
    %cst_28 = arith.constant 1.000000e+00 : f32
    %71 = vector.broadcast %cst_28 : f32 to vector<8x128xf32>
    %72 = math.atan2 %70, %71 : vector<8x128xf32>
    %73 = arith.divf %22, %25 : vector<8x128xf32>
    %cst_29 = arith.constant 1.000000e+00 : f32
    %74 = vector.broadcast %cst_29 : f32 to vector<8x128xf32>
    %75 = math.atan2 %73, %74 : vector<8x128xf32>
    %76 = arith.subf %72, %75 : vector<8x128xf32>
    %77 = arith.mulf %76, %76 : vector<8x128xf32>
    %cst_30 = arith.constant 0.405284733 : f32
    %78 = vector.broadcast %cst_30 : f32 to vector<8x128xf32>
    %79 = arith.mulf %78, %77 : vector<8x128xf32>
    %80 = arith.subf %79, %47 : vector<8x128xf32>
    %cst_31 = arith.constant 1.00000012 : f32
    %81 = vector.broadcast %cst_31 : f32 to vector<8x128xf32>
    %82 = arith.addf %80, %81 : vector<8x128xf32>
    %83 = arith.divf %79, %82 : vector<8x128xf32>
    %84 = arith.divf %69, %58 : vector<8x128xf32>
    %85 = arith.mulf %79, %83 : vector<8x128xf32>
    %86 = arith.addf %84, %85 : vector<8x128xf32>
    %87 = arith.subf %47, %86 : vector<8x128xf32>
    %cst_32 = arith.constant 1.000000e+00 : f32
    %88 = vector.broadcast %cst_32 : f32 to vector<8x128xf32>
    %89 = arith.subf %88, %87 : vector<8x128xf32>
    %90 = arith.mulf %89, %21 : vector<8x128xf32>
    %91 = arith.subf %17, %9 : vector<8x128xf32>
    %cst_33 = arith.constant 0.000000e+00 : f32
    %cst_34 = arith.constant 7.98999977 : f32
    %92 = vector.broadcast %cst_33 : f32 to vector<8x128xf32>
    %93 = arith.maximumf %92, %91 : vector<8x128xf32>
    %94 = vector.broadcast %cst_34 : f32 to vector<8x128xf32>
    %95 = arith.minimumf %94, %93 : vector<8x128xf32>
    %96 = arith.subf %19, %11 : vector<8x128xf32>
    %cst_35 = arith.constant 0.000000e+00 : f32
    %cst_36 = arith.constant 7.98999977 : f32
    %97 = vector.broadcast %cst_35 : f32 to vector<8x128xf32>
    %98 = arith.maximumf %97, %96 : vector<8x128xf32>
    %99 = vector.broadcast %cst_36 : f32 to vector<8x128xf32>
    %100 = arith.minimumf %99, %98 : vector<8x128xf32>
    %101 = arith.subf %13, %17 : vector<8x128xf32>
    %cst_37 = arith.constant 0.000000e+00 : f32
    %cst_38 = arith.constant 7.98999977 : f32
    %102 = vector.broadcast %cst_37 : f32 to vector<8x128xf32>
    %103 = arith.maximumf %102, %101 : vector<8x128xf32>
    %104 = vector.broadcast %cst_38 : f32 to vector<8x128xf32>
    %105 = arith.minimumf %104, %103 : vector<8x128xf32>
    %106 = arith.subf %15, %19 : vector<8x128xf32>
    %cst_39 = arith.constant 0.000000e+00 : f32
    %cst_40 = arith.constant 7.98999977 : f32
    %107 = vector.broadcast %cst_39 : f32 to vector<8x128xf32>
    %108 = arith.maximumf %107, %106 : vector<8x128xf32>
    %109 = vector.broadcast %cst_40 : f32 to vector<8x128xf32>
    %110 = arith.minimumf %109, %108 : vector<8x128xf32>
    %cst_41 = arith.constant 0.000000e+00 : f32
    %111 = vector.broadcast %cst_41 : f32 to vector<8x128xf32>
    %112 = math.floor %95 : vector<8x128xf32>
    %cst_42 = arith.constant 1.000000e+00 : f32
    %113 = vector.broadcast %cst_42 : f32 to vector<8x128xf32>
    %114 = arith.addf %112, %113 : vector<8x128xf32>
    %115 = arith.subf %114, %95 : vector<8x128xf32>
    %cst_43 = arith.constant 1.000000e+00 : f32
    %116 = vector.broadcast %cst_43 : f32 to vector<8x128xf32>
    %117 = arith.subf %116, %115 : vector<8x128xf32>
    %c0_44 = arith.constant 0 : index
    %c0_45 = arith.constant 0 : index
    %c0_46 = arith.constant 0 : index
    %118 = vector.load %arg2[%c0_44, %c0_45, %c0_46] : memref<36x8x128xf32, #tpu.memory_space<vmem>>, vector<1x8x128xf32>
    %119 = vector.shape_cast %118 : vector<1x8x128xf32> to vector<8x128xf32>
    %c1_47 = arith.constant 1 : index
    %c0_48 = arith.constant 0 : index
    %c0_49 = arith.constant 0 : index
    %120 = vector.load %arg2[%c1_47, %c0_48, %c0_49] : memref<36x8x128xf32, #tpu.memory_space<vmem>>, vector<1x8x128xf32>
    %121 = vector.shape_cast %120 : vector<1x8x128xf32> to vector<8x128xf32>
    %122 = arith.maximumf %119, %121 : vector<8x128xf32>
    %c2_50 = arith.constant 2 : index
    %c0_51 = arith.constant 0 : index
    %c0_52 = arith.constant 0 : index
    %123 = vector.load %arg2[%c2_50, %c0_51, %c0_52] : memref<36x8x128xf32, #tpu.memory_space<vmem>>, vector<1x8x128xf32>
    %124 = vector.shape_cast %123 : vector<1x8x128xf32> to vector<8x128xf32>
    %125 = arith.maximumf %122, %124 : vector<8x128xf32>
    %c3_53 = arith.constant 3 : index
    %c0_54 = arith.constant 0 : index
    %c0_55 = arith.constant 0 : index
    %126 = vector.load %arg2[%c3_53, %c0_54, %c0_55] : memref<36x8x128xf32, #tpu.memory_space<vmem>>, vector<1x8x128xf32>
    %127 = vector.shape_cast %126 : vector<1x8x128xf32> to vector<8x128xf32>
    %128 = arith.maximumf %125, %127 : vector<8x128xf32>
    %c4_56 = arith.constant 4 : index
    %c0_57 = arith.constant 0 : index
    %c0_58 = arith.constant 0 : index
    %129 = vector.load %arg2[%c4_56, %c0_57, %c0_58] : memref<36x8x128xf32, #tpu.memory_space<vmem>>, vector<1x8x128xf32>
    %130 = vector.shape_cast %129 : vector<1x8x128xf32> to vector<8x128xf32>
    %131 = arith.maximumf %128, %130 : vector<8x128xf32>
    %c5_59 = arith.constant 5 : index
    %c0_60 = arith.constant 0 : index
    %c0_61 = arith.constant 0 : index
    %132 = vector.load %arg2[%c5_59, %c0_60, %c0_61] : memref<36x8x128xf32, #tpu.memory_space<vmem>>, vector<1x8x128xf32>
    %133 = vector.shape_cast %132 : vector<1x8x128xf32> to vector<8x128xf32>
    %134 = arith.maximumf %131, %133 : vector<8x128xf32>
    %c6_62 = arith.constant 6 : index
    %c0_63 = arith.constant 0 : index
    %c0_64 = arith.constant 0 : index
    %135 = vector.load %arg2[%c6_62, %c0_63, %c0_64] : memref<36x8x128xf32, #tpu.memory_space<vmem>>, vector<1x8x128xf32>
    %136 = vector.shape_cast %135 : vector<1x8x128xf32> to vector<8x128xf32>
    %137 = arith.maximumf %134, %136 : vector<8x128xf32>
    %c7_65 = arith.constant 7 : index
    %c0_66 = arith.constant 0 : index
    %c0_67 = arith.constant 0 : index
    %138 = vector.load %arg2[%c7_65, %c0_66, %c0_67] : memref<36x8x128xf32, #tpu.memory_space<vmem>>, vector<1x8x128xf32>
    %139 = vector.shape_cast %138 : vector<1x8x128xf32> to vector<8x128xf32>
    %140 = arith.maximumf %137, %139 : vector<8x128xf32>
    %c8_68 = arith.constant 8 : index
    %c0_69 = arith.constant 0 : index
    %c0_70 = arith.constant 0 : index
    %141 = vector.load %arg2[%c8_68, %c0_69, %c0_70] : memref<36x8x128xf32, #tpu.memory_space<vmem>>, vector<1x8x128xf32>
    %142 = vector.shape_cast %141 : vector<1x8x128xf32> to vector<8x128xf32>
    %143 = arith.maximumf %140, %142 : vector<8x128xf32>
    %cst_71 = arith.constant 0.000000e+00 : f32
    %144 = vector.broadcast %cst_71 : f32 to vector<8x128xf32>
    %cst_72 = arith.constant 0.000000e+00 : f32
    %145 = vector.broadcast %cst_72 : f32 to vector<8x128xf32>
    %c0_73 = arith.constant 0 : index
    %c0_74 = arith.constant 0 : index
    %c0_75 = arith.constant 0 : index
    %146 = vector.load %arg2[%c0_73, %c0_74, %c0_75] : memref<36x8x128xf32, #tpu.memory_space<vmem>>, vector<1x8x128xf32>
    %147 = vector.shape_cast %146 : vector<1x8x128xf32> to vector<8x128xf32>
    %148 = arith.subf %147, %143 : vector<8x128xf32>
    %149 = math.exp %148 : vector<8x128xf32>
    %150 = arith.addf %144, %149 : vector<8x128xf32>
    %cst_76 = arith.constant 0.000000e+00 : f32
    %151 = vector.broadcast %cst_76 : f32 to vector<8x128xf32>
    %152 = arith.cmpf oeq, %112, %151 : vector<8x128xf32>
    %cst_77 = arith.constant 1.000000e+00 : f32
    %153 = vector.broadcast %cst_77 : f32 to vector<8x128xf32>
    %154 = arith.addf %112, %153 : vector<8x128xf32>
    %cst_78 = arith.constant 0.000000e+00 : f32
    %155 = vector.broadcast %cst_78 : f32 to vector<8x128xf32>
    %156 = arith.cmpf oeq, %154, %155 : vector<8x128xf32>
    %cst_79 = arith.constant 0.000000e+00 : f32
    %157 = vector.broadcast %cst_79 : f32 to vector<8x128xf32>
    %158 = arith.select %156, %117, %157 : vector<8x128xi1>, vector<8x128xf32>
    %159 = arith.select %152, %115, %158 : vector<8x128xi1>, vector<8x128xf32>
    %160 = arith.mulf %147, %159 : vector<8x128xf32>
    %161 = arith.addf %145, %160 : vector<8x128xf32>
    %c1_80 = arith.constant 1 : index
    %c0_81 = arith.constant 0 : index
    %c0_82 = arith.constant 0 : index
    %162 = vector.load %arg2[%c1_80, %c0_81, %c0_82] : memref<36x8x128xf32, #tpu.memory_space<vmem>>, vector<1x8x128xf32>
    %163 = vector.shape_cast %162 : vector<1x8x128xf32> to vector<8x128xf32>
    %164 = arith.subf %163, %143 : vector<8x128xf32>
    %165 = math.exp %164 : vector<8x128xf32>
    %166 = arith.addf %150, %165 : vector<8x128xf32>
    %cst_83 = arith.constant 1.000000e+00 : f32
    %167 = vector.broadcast %cst_83 : f32 to vector<8x128xf32>
    %168 = arith.cmpf oeq, %112, %167 : vector<8x128xf32>
    %cst_84 = arith.constant 1.000000e+00 : f32
    %169 = vector.broadcast %cst_84 : f32 to vector<8x128xf32>
    %170 = arith.addf %112, %169 : vector<8x128xf32>
    %cst_85 = arith.constant 1.000000e+00 : f32
    %171 = vector.broadcast %cst_85 : f32 to vector<8x128xf32>
    %172 = arith.cmpf oeq, %170, %171 : vector<8x128xf32>
    %cst_86 = arith.constant 0.000000e+00 : f32
    %173 = vector.broadcast %cst_86 : f32 to vector<8x128xf32>
    %174 = arith.select %172, %117, %173 : vector<8x128xi1>, vector<8x128xf32>
    %175 = arith.select %168, %115, %174 : vector<8x128xi1>, vector<8x128xf32>
    %176 = arith.mulf %163, %175 : vector<8x128xf32>
    %177 = arith.addf %161, %176 : vector<8x128xf32>
    %c2_87 = arith.constant 2 : index
    %c0_88 = arith.constant 0 : index
    %c0_89 = arith.constant 0 : index
    %178 = vector.load %arg2[%c2_87, %c0_88, %c0_89] : memref<36x8x128xf32, #tpu.memory_space<vmem>>, vector<1x8x128xf32>
    %179 = vector.shape_cast %178 : vector<1x8x128xf32> to vector<8x128xf32>
    %180 = arith.subf %179, %143 : vector<8x128xf32>
    %181 = math.exp %180 : vector<8x128xf32>
    %182 = arith.addf %166, %181 : vector<8x128xf32>
    %cst_90 = arith.constant 2.000000e+00 : f32
    %183 = vector.broadcast %cst_90 : f32 to vector<8x128xf32>
    %184 = arith.cmpf oeq, %112, %183 : vector<8x128xf32>
    %cst_91 = arith.constant 1.000000e+00 : f32
    %185 = vector.broadcast %cst_91 : f32 to vector<8x128xf32>
    %186 = arith.addf %112, %185 : vector<8x128xf32>
    %cst_92 = arith.constant 2.000000e+00 : f32
    %187 = vector.broadcast %cst_92 : f32 to vector<8x128xf32>
    %188 = arith.cmpf oeq, %186, %187 : vector<8x128xf32>
    %cst_93 = arith.constant 0.000000e+00 : f32
    %189 = vector.broadcast %cst_93 : f32 to vector<8x128xf32>
    %190 = arith.select %188, %117, %189 : vector<8x128xi1>, vector<8x128xf32>
    %191 = arith.select %184, %115, %190 : vector<8x128xi1>, vector<8x128xf32>
    %192 = arith.mulf %179, %191 : vector<8x128xf32>
    %193 = arith.addf %177, %192 : vector<8x128xf32>
    %c3_94 = arith.constant 3 : index
    %c0_95 = arith.constant 0 : index
    %c0_96 = arith.constant 0 : index
    %194 = vector.load %arg2[%c3_94, %c0_95, %c0_96] : memref<36x8x128xf32, #tpu.memory_space<vmem>>, vector<1x8x128xf32>
    %195 = vector.shape_cast %194 : vector<1x8x128xf32> to vector<8x128xf32>
    %196 = arith.subf %195, %143 : vector<8x128xf32>
    %197 = math.exp %196 : vector<8x128xf32>
    %198 = arith.addf %182, %197 : vector<8x128xf32>
    %cst_97 = arith.constant 3.000000e+00 : f32
    %199 = vector.broadcast %cst_97 : f32 to vector<8x128xf32>
    %200 = arith.cmpf oeq, %112, %199 : vector<8x128xf32>
    %cst_98 = arith.constant 1.000000e+00 : f32
    %201 = vector.broadcast %cst_98 : f32 to vector<8x128xf32>
    %202 = arith.addf %112, %201 : vector<8x128xf32>
    %cst_99 = arith.constant 3.000000e+00 : f32
    %203 = vector.broadcast %cst_99 : f32 to vector<8x128xf32>
    %204 = arith.cmpf oeq, %202, %203 : vector<8x128xf32>
    %cst_100 = arith.constant 0.000000e+00 : f32
    %205 = vector.broadcast %cst_100 : f32 to vector<8x128xf32>
    %206 = arith.select %204, %117, %205 : vector<8x128xi1>, vector<8x128xf32>
    %207 = arith.select %200, %115, %206 : vector<8x128xi1>, vector<8x128xf32>
    %208 = arith.mulf %195, %207 : vector<8x128xf32>
    %209 = arith.addf %193, %208 : vector<8x128xf32>
    %c4_101 = arith.constant 4 : index
    %c0_102 = arith.constant 0 : index
    %c0_103 = arith.constant 0 : index
    %210 = vector.load %arg2[%c4_101, %c0_102, %c0_103] : memref<36x8x128xf32, #tpu.memory_space<vmem>>, vector<1x8x128xf32>
    %211 = vector.shape_cast %210 : vector<1x8x128xf32> to vector<8x128xf32>
    %212 = arith.subf %211, %143 : vector<8x128xf32>
    %213 = math.exp %212 : vector<8x128xf32>
    %214 = arith.addf %198, %213 : vector<8x128xf32>
    %cst_104 = arith.constant 4.000000e+00 : f32
    %215 = vector.broadcast %cst_104 : f32 to vector<8x128xf32>
    %216 = arith.cmpf oeq, %112, %215 : vector<8x128xf32>
    %cst_105 = arith.constant 1.000000e+00 : f32
    %217 = vector.broadcast %cst_105 : f32 to vector<8x128xf32>
    %218 = arith.addf %112, %217 : vector<8x128xf32>
    %cst_106 = arith.constant 4.000000e+00 : f32
    %219 = vector.broadcast %cst_106 : f32 to vector<8x128xf32>
    %220 = arith.cmpf oeq, %218, %219 : vector<8x128xf32>
    %cst_107 = arith.constant 0.000000e+00 : f32
    %221 = vector.broadcast %cst_107 : f32 to vector<8x128xf32>
    %222 = arith.select %220, %117, %221 : vector<8x128xi1>, vector<8x128xf32>
    %223 = arith.select %216, %115, %222 : vector<8x128xi1>, vector<8x128xf32>
    %224 = arith.mulf %211, %223 : vector<8x128xf32>
    %225 = arith.addf %209, %224 : vector<8x128xf32>
    %c5_108 = arith.constant 5 : index
    %c0_109 = arith.constant 0 : index
    %c0_110 = arith.constant 0 : index
    %226 = vector.load %arg2[%c5_108, %c0_109, %c0_110] : memref<36x8x128xf32, #tpu.memory_space<vmem>>, vector<1x8x128xf32>
    %227 = vector.shape_cast %226 : vector<1x8x128xf32> to vector<8x128xf32>
    %228 = arith.subf %227, %143 : vector<8x128xf32>
    %229 = math.exp %228 : vector<8x128xf32>
    %230 = arith.addf %214, %229 : vector<8x128xf32>
    %cst_111 = arith.constant 5.000000e+00 : f32
    %231 = vector.broadcast %cst_111 : f32 to vector<8x128xf32>
    %232 = arith.cmpf oeq, %112, %231 : vector<8x128xf32>
    %cst_112 = arith.constant 1.000000e+00 : f32
    %233 = vector.broadcast %cst_112 : f32 to vector<8x128xf32>
    %234 = arith.addf %112, %233 : vector<8x128xf32>
    %cst_113 = arith.constant 5.000000e+00 : f32
    %235 = vector.broadcast %cst_113 : f32 to vector<8x128xf32>
    %236 = arith.cmpf oeq, %234, %235 : vector<8x128xf32>
    %cst_114 = arith.constant 0.000000e+00 : f32
    %237 = vector.broadcast %cst_114 : f32 to vector<8x128xf32>
    %238 = arith.select %236, %117, %237 : vector<8x128xi1>, vector<8x128xf32>
    %239 = arith.select %232, %115, %238 : vector<8x128xi1>, vector<8x128xf32>
    %240 = arith.mulf %227, %239 : vector<8x128xf32>
    %241 = arith.addf %225, %240 : vector<8x128xf32>
    %c6_115 = arith.constant 6 : index
    %c0_116 = arith.constant 0 : index
    %c0_117 = arith.constant 0 : index
    %242 = vector.load %arg2[%c6_115, %c0_116, %c0_117] : memref<36x8x128xf32, #tpu.memory_space<vmem>>, vector<1x8x128xf32>
    %243 = vector.shape_cast %242 : vector<1x8x128xf32> to vector<8x128xf32>
    %244 = arith.subf %243, %143 : vector<8x128xf32>
    %245 = math.exp %244 : vector<8x128xf32>
    %246 = arith.addf %230, %245 : vector<8x128xf32>
    %cst_118 = arith.constant 6.000000e+00 : f32
    %247 = vector.broadcast %cst_118 : f32 to vector<8x128xf32>
    %248 = arith.cmpf oeq, %112, %247 : vector<8x128xf32>
    %cst_119 = arith.constant 1.000000e+00 : f32
    %249 = vector.broadcast %cst_119 : f32 to vector<8x128xf32>
    %250 = arith.addf %112, %249 : vector<8x128xf32>
    %cst_120 = arith.constant 6.000000e+00 : f32
    %251 = vector.broadcast %cst_120 : f32 to vector<8x128xf32>
    %252 = arith.cmpf oeq, %250, %251 : vector<8x128xf32>
    %cst_121 = arith.constant 0.000000e+00 : f32
    %253 = vector.broadcast %cst_121 : f32 to vector<8x128xf32>
    %254 = arith.select %252, %117, %253 : vector<8x128xi1>, vector<8x128xf32>
    %255 = arith.select %248, %115, %254 : vector<8x128xi1>, vector<8x128xf32>
    %256 = arith.mulf %243, %255 : vector<8x128xf32>
    %257 = arith.addf %241, %256 : vector<8x128xf32>
    %c7_122 = arith.constant 7 : index
    %c0_123 = arith.constant 0 : index
    %c0_124 = arith.constant 0 : index
    %258 = vector.load %arg2[%c7_122, %c0_123, %c0_124] : memref<36x8x128xf32, #tpu.memory_space<vmem>>, vector<1x8x128xf32>
    %259 = vector.shape_cast %258 : vector<1x8x128xf32> to vector<8x128xf32>
    %260 = arith.subf %259, %143 : vector<8x128xf32>
    %261 = math.exp %260 : vector<8x128xf32>
    %262 = arith.addf %246, %261 : vector<8x128xf32>
    %cst_125 = arith.constant 7.000000e+00 : f32
    %263 = vector.broadcast %cst_125 : f32 to vector<8x128xf32>
    %264 = arith.cmpf oeq, %112, %263 : vector<8x128xf32>
    %cst_126 = arith.constant 1.000000e+00 : f32
    %265 = vector.broadcast %cst_126 : f32 to vector<8x128xf32>
    %266 = arith.addf %112, %265 : vector<8x128xf32>
    %cst_127 = arith.constant 7.000000e+00 : f32
    %267 = vector.broadcast %cst_127 : f32 to vector<8x128xf32>
    %268 = arith.cmpf oeq, %266, %267 : vector<8x128xf32>
    %cst_128 = arith.constant 0.000000e+00 : f32
    %269 = vector.broadcast %cst_128 : f32 to vector<8x128xf32>
    %270 = arith.select %268, %117, %269 : vector<8x128xi1>, vector<8x128xf32>
    %271 = arith.select %264, %115, %270 : vector<8x128xi1>, vector<8x128xf32>
    %272 = arith.mulf %259, %271 : vector<8x128xf32>
    %273 = arith.addf %257, %272 : vector<8x128xf32>
    %c8_129 = arith.constant 8 : index
    %c0_130 = arith.constant 0 : index
    %c0_131 = arith.constant 0 : index
    %274 = vector.load %arg2[%c8_129, %c0_130, %c0_131] : memref<36x8x128xf32, #tpu.memory_space<vmem>>, vector<1x8x128xf32>
    %275 = vector.shape_cast %274 : vector<1x8x128xf32> to vector<8x128xf32>
    %276 = arith.subf %275, %143 : vector<8x128xf32>
    %277 = math.exp %276 : vector<8x128xf32>
    %278 = arith.addf %262, %277 : vector<8x128xf32>
    %cst_132 = arith.constant 8.000000e+00 : f32
    %279 = vector.broadcast %cst_132 : f32 to vector<8x128xf32>
    %280 = arith.cmpf oeq, %112, %279 : vector<8x128xf32>
    %cst_133 = arith.constant 1.000000e+00 : f32
    %281 = vector.broadcast %cst_133 : f32 to vector<8x128xf32>
    %282 = arith.addf %112, %281 : vector<8x128xf32>
    %cst_134 = arith.constant 8.000000e+00 : f32
    %283 = vector.broadcast %cst_134 : f32 to vector<8x128xf32>
    %284 = arith.cmpf oeq, %282, %283 : vector<8x128xf32>
    %cst_135 = arith.constant 0.000000e+00 : f32
    %285 = vector.broadcast %cst_135 : f32 to vector<8x128xf32>
    %286 = arith.select %284, %117, %285 : vector<8x128xi1>, vector<8x128xf32>
    %287 = arith.select %280, %115, %286 : vector<8x128xi1>, vector<8x128xf32>
    %288 = arith.mulf %275, %287 : vector<8x128xf32>
    %289 = arith.addf %273, %288 : vector<8x128xf32>
    %290 = math.log %278 : vector<8x128xf32>
    %291 = arith.addf %143, %290 : vector<8x128xf32>
    %292 = arith.addf %111, %291 : vector<8x128xf32>
    %293 = arith.subf %292, %289 : vector<8x128xf32>
    %294 = math.floor %100 : vector<8x128xf32>
    %cst_136 = arith.constant 1.000000e+00 : f32
    %295 = vector.broadcast %cst_136 : f32 to vector<8x128xf32>
    %296 = arith.addf %294, %295 : vector<8x128xf32>
    %297 = arith.subf %296, %100 : vector<8x128xf32>
    %cst_137 = arith.constant 1.000000e+00 : f32
    %298 = vector.broadcast %cst_137 : f32 to vector<8x128xf32>
    %299 = arith.subf %298, %297 : vector<8x128xf32>
    %c9_138 = arith.constant 9 : index
    %c0_139 = arith.constant 0 : index
    %c0_140 = arith.constant 0 : index
    %300 = vector.load %arg2[%c9_138, %c0_139, %c0_140] : memref<36x8x128xf32, #tpu.memory_space<vmem>>, vector<1x8x128xf32>
    %301 = vector.shape_cast %300 : vector<1x8x128xf32> to vector<8x128xf32>
    %c10_141 = arith.constant 10 : index
    %c0_142 = arith.constant 0 : index
    %c0_143 = arith.constant 0 : index
    %302 = vector.load %arg2[%c10_141, %c0_142, %c0_143] : memref<36x8x128xf32, #tpu.memory_space<vmem>>, vector<1x8x128xf32>
    %303 = vector.shape_cast %302 : vector<1x8x128xf32> to vector<8x128xf32>
    %304 = arith.maximumf %301, %303 : vector<8x128xf32>
    %c11 = arith.constant 11 : index
    %c0_144 = arith.constant 0 : index
    %c0_145 = arith.constant 0 : index
    %305 = vector.load %arg2[%c11, %c0_144, %c0_145] : memref<36x8x128xf32, #tpu.memory_space<vmem>>, vector<1x8x128xf32>
    %306 = vector.shape_cast %305 : vector<1x8x128xf32> to vector<8x128xf32>
    %307 = arith.maximumf %304, %306 : vector<8x128xf32>
    %c12 = arith.constant 12 : index
    %c0_146 = arith.constant 0 : index
    %c0_147 = arith.constant 0 : index
    %308 = vector.load %arg2[%c12, %c0_146, %c0_147] : memref<36x8x128xf32, #tpu.memory_space<vmem>>, vector<1x8x128xf32>
    %309 = vector.shape_cast %308 : vector<1x8x128xf32> to vector<8x128xf32>
    %310 = arith.maximumf %307, %309 : vector<8x128xf32>
    %c13 = arith.constant 13 : index
    %c0_148 = arith.constant 0 : index
    %c0_149 = arith.constant 0 : index
    %311 = vector.load %arg2[%c13, %c0_148, %c0_149] : memref<36x8x128xf32, #tpu.memory_space<vmem>>, vector<1x8x128xf32>
    %312 = vector.shape_cast %311 : vector<1x8x128xf32> to vector<8x128xf32>
    %313 = arith.maximumf %310, %312 : vector<8x128xf32>
    %c14 = arith.constant 14 : index
    %c0_150 = arith.constant 0 : index
    %c0_151 = arith.constant 0 : index
    %314 = vector.load %arg2[%c14, %c0_150, %c0_151] : memref<36x8x128xf32, #tpu.memory_space<vmem>>, vector<1x8x128xf32>
    %315 = vector.shape_cast %314 : vector<1x8x128xf32> to vector<8x128xf32>
    %316 = arith.maximumf %313, %315 : vector<8x128xf32>
    %c15 = arith.constant 15 : index
    %c0_152 = arith.constant 0 : index
    %c0_153 = arith.constant 0 : index
    %317 = vector.load %arg2[%c15, %c0_152, %c0_153] : memref<36x8x128xf32, #tpu.memory_space<vmem>>, vector<1x8x128xf32>
    %318 = vector.shape_cast %317 : vector<1x8x128xf32> to vector<8x128xf32>
    %319 = arith.maximumf %316, %318 : vector<8x128xf32>
    %c16 = arith.constant 16 : index
    %c0_154 = arith.constant 0 : index
    %c0_155 = arith.constant 0 : index
    %320 = vector.load %arg2[%c16, %c0_154, %c0_155] : memref<36x8x128xf32, #tpu.memory_space<vmem>>, vector<1x8x128xf32>
    %321 = vector.shape_cast %320 : vector<1x8x128xf32> to vector<8x128xf32>
    %322 = arith.maximumf %319, %321 : vector<8x128xf32>
    %c17 = arith.constant 17 : index
    %c0_156 = arith.constant 0 : index
    %c0_157 = arith.constant 0 : index
    %323 = vector.load %arg2[%c17, %c0_156, %c0_157] : memref<36x8x128xf32, #tpu.memory_space<vmem>>, vector<1x8x128xf32>
    %324 = vector.shape_cast %323 : vector<1x8x128xf32> to vector<8x128xf32>
    %325 = arith.maximumf %322, %324 : vector<8x128xf32>
    %cst_158 = arith.constant 0.000000e+00 : f32
    %326 = vector.broadcast %cst_158 : f32 to vector<8x128xf32>
    %cst_159 = arith.constant 0.000000e+00 : f32
    %327 = vector.broadcast %cst_159 : f32 to vector<8x128xf32>
    %c9_160 = arith.constant 9 : index
    %c0_161 = arith.constant 0 : index
    %c0_162 = arith.constant 0 : index
    %328 = vector.load %arg2[%c9_160, %c0_161, %c0_162] : memref<36x8x128xf32, #tpu.memory_space<vmem>>, vector<1x8x128xf32>
    %329 = vector.shape_cast %328 : vector<1x8x128xf32> to vector<8x128xf32>
    %330 = arith.subf %329, %325 : vector<8x128xf32>
    %331 = math.exp %330 : vector<8x128xf32>
    %332 = arith.addf %326, %331 : vector<8x128xf32>
    %cst_163 = arith.constant 0.000000e+00 : f32
    %333 = vector.broadcast %cst_163 : f32 to vector<8x128xf32>
    %334 = arith.cmpf oeq, %294, %333 : vector<8x128xf32>
    %cst_164 = arith.constant 1.000000e+00 : f32
    %335 = vector.broadcast %cst_164 : f32 to vector<8x128xf32>
    %336 = arith.addf %294, %335 : vector<8x128xf32>
    %cst_165 = arith.constant 0.000000e+00 : f32
    %337 = vector.broadcast %cst_165 : f32 to vector<8x128xf32>
    %338 = arith.cmpf oeq, %336, %337 : vector<8x128xf32>
    %cst_166 = arith.constant 0.000000e+00 : f32
    %339 = vector.broadcast %cst_166 : f32 to vector<8x128xf32>
    %340 = arith.select %338, %299, %339 : vector<8x128xi1>, vector<8x128xf32>
    %341 = arith.select %334, %297, %340 : vector<8x128xi1>, vector<8x128xf32>
    %342 = arith.mulf %329, %341 : vector<8x128xf32>
    %343 = arith.addf %327, %342 : vector<8x128xf32>
    %c10_167 = arith.constant 10 : index
    %c0_168 = arith.constant 0 : index
    %c0_169 = arith.constant 0 : index
    %344 = vector.load %arg2[%c10_167, %c0_168, %c0_169] : memref<36x8x128xf32, #tpu.memory_space<vmem>>, vector<1x8x128xf32>
    %345 = vector.shape_cast %344 : vector<1x8x128xf32> to vector<8x128xf32>
    %346 = arith.subf %345, %325 : vector<8x128xf32>
    %347 = math.exp %346 : vector<8x128xf32>
    %348 = arith.addf %332, %347 : vector<8x128xf32>
    %cst_170 = arith.constant 1.000000e+00 : f32
    %349 = vector.broadcast %cst_170 : f32 to vector<8x128xf32>
    %350 = arith.cmpf oeq, %294, %349 : vector<8x128xf32>
    %cst_171 = arith.constant 1.000000e+00 : f32
    %351 = vector.broadcast %cst_171 : f32 to vector<8x128xf32>
    %352 = arith.addf %294, %351 : vector<8x128xf32>
    %cst_172 = arith.constant 1.000000e+00 : f32
    %353 = vector.broadcast %cst_172 : f32 to vector<8x128xf32>
    %354 = arith.cmpf oeq, %352, %353 : vector<8x128xf32>
    %cst_173 = arith.constant 0.000000e+00 : f32
    %355 = vector.broadcast %cst_173 : f32 to vector<8x128xf32>
    %356 = arith.select %354, %299, %355 : vector<8x128xi1>, vector<8x128xf32>
    %357 = arith.select %350, %297, %356 : vector<8x128xi1>, vector<8x128xf32>
    %358 = arith.mulf %345, %357 : vector<8x128xf32>
    %359 = arith.addf %343, %358 : vector<8x128xf32>
    %c11_174 = arith.constant 11 : index
    %c0_175 = arith.constant 0 : index
    %c0_176 = arith.constant 0 : index
    %360 = vector.load %arg2[%c11_174, %c0_175, %c0_176] : memref<36x8x128xf32, #tpu.memory_space<vmem>>, vector<1x8x128xf32>
    %361 = vector.shape_cast %360 : vector<1x8x128xf32> to vector<8x128xf32>
    %362 = arith.subf %361, %325 : vector<8x128xf32>
    %363 = math.exp %362 : vector<8x128xf32>
    %364 = arith.addf %348, %363 : vector<8x128xf32>
    %cst_177 = arith.constant 2.000000e+00 : f32
    %365 = vector.broadcast %cst_177 : f32 to vector<8x128xf32>
    %366 = arith.cmpf oeq, %294, %365 : vector<8x128xf32>
    %cst_178 = arith.constant 1.000000e+00 : f32
    %367 = vector.broadcast %cst_178 : f32 to vector<8x128xf32>
    %368 = arith.addf %294, %367 : vector<8x128xf32>
    %cst_179 = arith.constant 2.000000e+00 : f32
    %369 = vector.broadcast %cst_179 : f32 to vector<8x128xf32>
    %370 = arith.cmpf oeq, %368, %369 : vector<8x128xf32>
    %cst_180 = arith.constant 0.000000e+00 : f32
    %371 = vector.broadcast %cst_180 : f32 to vector<8x128xf32>
    %372 = arith.select %370, %299, %371 : vector<8x128xi1>, vector<8x128xf32>
    %373 = arith.select %366, %297, %372 : vector<8x128xi1>, vector<8x128xf32>
    %374 = arith.mulf %361, %373 : vector<8x128xf32>
    %375 = arith.addf %359, %374 : vector<8x128xf32>
    %c12_181 = arith.constant 12 : index
    %c0_182 = arith.constant 0 : index
    %c0_183 = arith.constant 0 : index
    %376 = vector.load %arg2[%c12_181, %c0_182, %c0_183] : memref<36x8x128xf32, #tpu.memory_space<vmem>>, vector<1x8x128xf32>
    %377 = vector.shape_cast %376 : vector<1x8x128xf32> to vector<8x128xf32>
    %378 = arith.subf %377, %325 : vector<8x128xf32>
    %379 = math.exp %378 : vector<8x128xf32>
    %380 = arith.addf %364, %379 : vector<8x128xf32>
    %cst_184 = arith.constant 3.000000e+00 : f32
    %381 = vector.broadcast %cst_184 : f32 to vector<8x128xf32>
    %382 = arith.cmpf oeq, %294, %381 : vector<8x128xf32>
    %cst_185 = arith.constant 1.000000e+00 : f32
    %383 = vector.broadcast %cst_185 : f32 to vector<8x128xf32>
    %384 = arith.addf %294, %383 : vector<8x128xf32>
    %cst_186 = arith.constant 3.000000e+00 : f32
    %385 = vector.broadcast %cst_186 : f32 to vector<8x128xf32>
    %386 = arith.cmpf oeq, %384, %385 : vector<8x128xf32>
    %cst_187 = arith.constant 0.000000e+00 : f32
    %387 = vector.broadcast %cst_187 : f32 to vector<8x128xf32>
    %388 = arith.select %386, %299, %387 : vector<8x128xi1>, vector<8x128xf32>
    %389 = arith.select %382, %297, %388 : vector<8x128xi1>, vector<8x128xf32>
    %390 = arith.mulf %377, %389 : vector<8x128xf32>
    %391 = arith.addf %375, %390 : vector<8x128xf32>
    %c13_188 = arith.constant 13 : index
    %c0_189 = arith.constant 0 : index
    %c0_190 = arith.constant 0 : index
    %392 = vector.load %arg2[%c13_188, %c0_189, %c0_190] : memref<36x8x128xf32, #tpu.memory_space<vmem>>, vector<1x8x128xf32>
    %393 = vector.shape_cast %392 : vector<1x8x128xf32> to vector<8x128xf32>
    %394 = arith.subf %393, %325 : vector<8x128xf32>
    %395 = math.exp %394 : vector<8x128xf32>
    %396 = arith.addf %380, %395 : vector<8x128xf32>
    %cst_191 = arith.constant 4.000000e+00 : f32
    %397 = vector.broadcast %cst_191 : f32 to vector<8x128xf32>
    %398 = arith.cmpf oeq, %294, %397 : vector<8x128xf32>
    %cst_192 = arith.constant 1.000000e+00 : f32
    %399 = vector.broadcast %cst_192 : f32 to vector<8x128xf32>
    %400 = arith.addf %294, %399 : vector<8x128xf32>
    %cst_193 = arith.constant 4.000000e+00 : f32
    %401 = vector.broadcast %cst_193 : f32 to vector<8x128xf32>
    %402 = arith.cmpf oeq, %400, %401 : vector<8x128xf32>
    %cst_194 = arith.constant 0.000000e+00 : f32
    %403 = vector.broadcast %cst_194 : f32 to vector<8x128xf32>
    %404 = arith.select %402, %299, %403 : vector<8x128xi1>, vector<8x128xf32>
    %405 = arith.select %398, %297, %404 : vector<8x128xi1>, vector<8x128xf32>
    %406 = arith.mulf %393, %405 : vector<8x128xf32>
    %407 = arith.addf %391, %406 : vector<8x128xf32>
    %c14_195 = arith.constant 14 : index
    %c0_196 = arith.constant 0 : index
    %c0_197 = arith.constant 0 : index
    %408 = vector.load %arg2[%c14_195, %c0_196, %c0_197] : memref<36x8x128xf32, #tpu.memory_space<vmem>>, vector<1x8x128xf32>
    %409 = vector.shape_cast %408 : vector<1x8x128xf32> to vector<8x128xf32>
    %410 = arith.subf %409, %325 : vector<8x128xf32>
    %411 = math.exp %410 : vector<8x128xf32>
    %412 = arith.addf %396, %411 : vector<8x128xf32>
    %cst_198 = arith.constant 5.000000e+00 : f32
    %413 = vector.broadcast %cst_198 : f32 to vector<8x128xf32>
    %414 = arith.cmpf oeq, %294, %413 : vector<8x128xf32>
    %cst_199 = arith.constant 1.000000e+00 : f32
    %415 = vector.broadcast %cst_199 : f32 to vector<8x128xf32>
    %416 = arith.addf %294, %415 : vector<8x128xf32>
    %cst_200 = arith.constant 5.000000e+00 : f32
    %417 = vector.broadcast %cst_200 : f32 to vector<8x128xf32>
    %418 = arith.cmpf oeq, %416, %417 : vector<8x128xf32>
    %cst_201 = arith.constant 0.000000e+00 : f32
    %419 = vector.broadcast %cst_201 : f32 to vector<8x128xf32>
    %420 = arith.select %418, %299, %419 : vector<8x128xi1>, vector<8x128xf32>
    %421 = arith.select %414, %297, %420 : vector<8x128xi1>, vector<8x128xf32>
    %422 = arith.mulf %409, %421 : vector<8x128xf32>
    %423 = arith.addf %407, %422 : vector<8x128xf32>
    %c15_202 = arith.constant 15 : index
    %c0_203 = arith.constant 0 : index
    %c0_204 = arith.constant 0 : index
    %424 = vector.load %arg2[%c15_202, %c0_203, %c0_204] : memref<36x8x128xf32, #tpu.memory_space<vmem>>, vector<1x8x128xf32>
    %425 = vector.shape_cast %424 : vector<1x8x128xf32> to vector<8x128xf32>
    %426 = arith.subf %425, %325 : vector<8x128xf32>
    %427 = math.exp %426 : vector<8x128xf32>
    %428 = arith.addf %412, %427 : vector<8x128xf32>
    %cst_205 = arith.constant 6.000000e+00 : f32
    %429 = vector.broadcast %cst_205 : f32 to vector<8x128xf32>
    %430 = arith.cmpf oeq, %294, %429 : vector<8x128xf32>
    %cst_206 = arith.constant 1.000000e+00 : f32
    %431 = vector.broadcast %cst_206 : f32 to vector<8x128xf32>
    %432 = arith.addf %294, %431 : vector<8x128xf32>
    %cst_207 = arith.constant 6.000000e+00 : f32
    %433 = vector.broadcast %cst_207 : f32 to vector<8x128xf32>
    %434 = arith.cmpf oeq, %432, %433 : vector<8x128xf32>
    %cst_208 = arith.constant 0.000000e+00 : f32
    %435 = vector.broadcast %cst_208 : f32 to vector<8x128xf32>
    %436 = arith.select %434, %299, %435 : vector<8x128xi1>, vector<8x128xf32>
    %437 = arith.select %430, %297, %436 : vector<8x128xi1>, vector<8x128xf32>
    %438 = arith.mulf %425, %437 : vector<8x128xf32>
    %439 = arith.addf %423, %438 : vector<8x128xf32>
    %c16_209 = arith.constant 16 : index
    %c0_210 = arith.constant 0 : index
    %c0_211 = arith.constant 0 : index
    %440 = vector.load %arg2[%c16_209, %c0_210, %c0_211] : memref<36x8x128xf32, #tpu.memory_space<vmem>>, vector<1x8x128xf32>
    %441 = vector.shape_cast %440 : vector<1x8x128xf32> to vector<8x128xf32>
    %442 = arith.subf %441, %325 : vector<8x128xf32>
    %443 = math.exp %442 : vector<8x128xf32>
    %444 = arith.addf %428, %443 : vector<8x128xf32>
    %cst_212 = arith.constant 7.000000e+00 : f32
    %445 = vector.broadcast %cst_212 : f32 to vector<8x128xf32>
    %446 = arith.cmpf oeq, %294, %445 : vector<8x128xf32>
    %cst_213 = arith.constant 1.000000e+00 : f32
    %447 = vector.broadcast %cst_213 : f32 to vector<8x128xf32>
    %448 = arith.addf %294, %447 : vector<8x128xf32>
    %cst_214 = arith.constant 7.000000e+00 : f32
    %449 = vector.broadcast %cst_214 : f32 to vector<8x128xf32>
    %450 = arith.cmpf oeq, %448, %449 : vector<8x128xf32>
    %cst_215 = arith.constant 0.000000e+00 : f32
    %451 = vector.broadcast %cst_215 : f32 to vector<8x128xf32>
    %452 = arith.select %450, %299, %451 : vector<8x128xi1>, vector<8x128xf32>
    %453 = arith.select %446, %297, %452 : vector<8x128xi1>, vector<8x128xf32>
    %454 = arith.mulf %441, %453 : vector<8x128xf32>
    %455 = arith.addf %439, %454 : vector<8x128xf32>
    %c17_216 = arith.constant 17 : index
    %c0_217 = arith.constant 0 : index
    %c0_218 = arith.constant 0 : index
    %456 = vector.load %arg2[%c17_216, %c0_217, %c0_218] : memref<36x8x128xf32, #tpu.memory_space<vmem>>, vector<1x8x128xf32>
    %457 = vector.shape_cast %456 : vector<1x8x128xf32> to vector<8x128xf32>
    %458 = arith.subf %457, %325 : vector<8x128xf32>
    %459 = math.exp %458 : vector<8x128xf32>
    %460 = arith.addf %444, %459 : vector<8x128xf32>
    %cst_219 = arith.constant 8.000000e+00 : f32
    %461 = vector.broadcast %cst_219 : f32 to vector<8x128xf32>
    %462 = arith.cmpf oeq, %294, %461 : vector<8x128xf32>
    %cst_220 = arith.constant 1.000000e+00 : f32
    %463 = vector.broadcast %cst_220 : f32 to vector<8x128xf32>
    %464 = arith.addf %294, %463 : vector<8x128xf32>
    %cst_221 = arith.constant 8.000000e+00 : f32
    %465 = vector.broadcast %cst_221 : f32 to vector<8x128xf32>
    %466 = arith.cmpf oeq, %464, %465 : vector<8x128xf32>
    %cst_222 = arith.constant 0.000000e+00 : f32
    %467 = vector.broadcast %cst_222 : f32 to vector<8x128xf32>
    %468 = arith.select %466, %299, %467 : vector<8x128xi1>, vector<8x128xf32>
    %469 = arith.select %462, %297, %468 : vector<8x128xi1>, vector<8x128xf32>
    %470 = arith.mulf %457, %469 : vector<8x128xf32>
    %471 = arith.addf %455, %470 : vector<8x128xf32>
    %472 = math.log %460 : vector<8x128xf32>
    %473 = arith.addf %325, %472 : vector<8x128xf32>
    %474 = arith.addf %293, %473 : vector<8x128xf32>
    %475 = arith.subf %474, %471 : vector<8x128xf32>
    %476 = math.floor %105 : vector<8x128xf32>
    %cst_223 = arith.constant 1.000000e+00 : f32
    %477 = vector.broadcast %cst_223 : f32 to vector<8x128xf32>
    %478 = arith.addf %476, %477 : vector<8x128xf32>
    %479 = arith.subf %478, %105 : vector<8x128xf32>
    %cst_224 = arith.constant 1.000000e+00 : f32
    %480 = vector.broadcast %cst_224 : f32 to vector<8x128xf32>
    %481 = arith.subf %480, %479 : vector<8x128xf32>
    %c18 = arith.constant 18 : index
    %c0_225 = arith.constant 0 : index
    %c0_226 = arith.constant 0 : index
    %482 = vector.load %arg2[%c18, %c0_225, %c0_226] : memref<36x8x128xf32, #tpu.memory_space<vmem>>, vector<1x8x128xf32>
    %483 = vector.shape_cast %482 : vector<1x8x128xf32> to vector<8x128xf32>
    %c19 = arith.constant 19 : index
    %c0_227 = arith.constant 0 : index
    %c0_228 = arith.constant 0 : index
    %484 = vector.load %arg2[%c19, %c0_227, %c0_228] : memref<36x8x128xf32, #tpu.memory_space<vmem>>, vector<1x8x128xf32>
    %485 = vector.shape_cast %484 : vector<1x8x128xf32> to vector<8x128xf32>
    %486 = arith.maximumf %483, %485 : vector<8x128xf32>
    %c20 = arith.constant 20 : index
    %c0_229 = arith.constant 0 : index
    %c0_230 = arith.constant 0 : index
    %487 = vector.load %arg2[%c20, %c0_229, %c0_230] : memref<36x8x128xf32, #tpu.memory_space<vmem>>, vector<1x8x128xf32>
    %488 = vector.shape_cast %487 : vector<1x8x128xf32> to vector<8x128xf32>
    %489 = arith.maximumf %486, %488 : vector<8x128xf32>
    %c21 = arith.constant 21 : index
    %c0_231 = arith.constant 0 : index
    %c0_232 = arith.constant 0 : index
    %490 = vector.load %arg2[%c21, %c0_231, %c0_232] : memref<36x8x128xf32, #tpu.memory_space<vmem>>, vector<1x8x128xf32>
    %491 = vector.shape_cast %490 : vector<1x8x128xf32> to vector<8x128xf32>
    %492 = arith.maximumf %489, %491 : vector<8x128xf32>
    %c22 = arith.constant 22 : index
    %c0_233 = arith.constant 0 : index
    %c0_234 = arith.constant 0 : index
    %493 = vector.load %arg2[%c22, %c0_233, %c0_234] : memref<36x8x128xf32, #tpu.memory_space<vmem>>, vector<1x8x128xf32>
    %494 = vector.shape_cast %493 : vector<1x8x128xf32> to vector<8x128xf32>
    %495 = arith.maximumf %492, %494 : vector<8x128xf32>
    %c23 = arith.constant 23 : index
    %c0_235 = arith.constant 0 : index
    %c0_236 = arith.constant 0 : index
    %496 = vector.load %arg2[%c23, %c0_235, %c0_236] : memref<36x8x128xf32, #tpu.memory_space<vmem>>, vector<1x8x128xf32>
    %497 = vector.shape_cast %496 : vector<1x8x128xf32> to vector<8x128xf32>
    %498 = arith.maximumf %495, %497 : vector<8x128xf32>
    %c24 = arith.constant 24 : index
    %c0_237 = arith.constant 0 : index
    %c0_238 = arith.constant 0 : index
    %499 = vector.load %arg2[%c24, %c0_237, %c0_238] : memref<36x8x128xf32, #tpu.memory_space<vmem>>, vector<1x8x128xf32>
    %500 = vector.shape_cast %499 : vector<1x8x128xf32> to vector<8x128xf32>
    %501 = arith.maximumf %498, %500 : vector<8x128xf32>
    %c25 = arith.constant 25 : index
    %c0_239 = arith.constant 0 : index
    %c0_240 = arith.constant 0 : index
    %502 = vector.load %arg2[%c25, %c0_239, %c0_240] : memref<36x8x128xf32, #tpu.memory_space<vmem>>, vector<1x8x128xf32>
    %503 = vector.shape_cast %502 : vector<1x8x128xf32> to vector<8x128xf32>
    %504 = arith.maximumf %501, %503 : vector<8x128xf32>
    %c26 = arith.constant 26 : index
    %c0_241 = arith.constant 0 : index
    %c0_242 = arith.constant 0 : index
    %505 = vector.load %arg2[%c26, %c0_241, %c0_242] : memref<36x8x128xf32, #tpu.memory_space<vmem>>, vector<1x8x128xf32>
    %506 = vector.shape_cast %505 : vector<1x8x128xf32> to vector<8x128xf32>
    %507 = arith.maximumf %504, %506 : vector<8x128xf32>
    %cst_243 = arith.constant 0.000000e+00 : f32
    %508 = vector.broadcast %cst_243 : f32 to vector<8x128xf32>
    %cst_244 = arith.constant 0.000000e+00 : f32
    %509 = vector.broadcast %cst_244 : f32 to vector<8x128xf32>
    %c18_245 = arith.constant 18 : index
    %c0_246 = arith.constant 0 : index
    %c0_247 = arith.constant 0 : index
    %510 = vector.load %arg2[%c18_245, %c0_246, %c0_247] : memref<36x8x128xf32, #tpu.memory_space<vmem>>, vector<1x8x128xf32>
    %511 = vector.shape_cast %510 : vector<1x8x128xf32> to vector<8x128xf32>
    %512 = arith.subf %511, %507 : vector<8x128xf32>
    %513 = math.exp %512 : vector<8x128xf32>
    %514 = arith.addf %508, %513 : vector<8x128xf32>
    %cst_248 = arith.constant 0.000000e+00 : f32
    %515 = vector.broadcast %cst_248 : f32 to vector<8x128xf32>
    %516 = arith.cmpf oeq, %476, %515 : vector<8x128xf32>
    %cst_249 = arith.constant 1.000000e+00 : f32
    %517 = vector.broadcast %cst_249 : f32 to vector<8x128xf32>
    %518 = arith.addf %476, %517 : vector<8x128xf32>
    %cst_250 = arith.constant 0.000000e+00 : f32
    %519 = vector.broadcast %cst_250 : f32 to vector<8x128xf32>
    %520 = arith.cmpf oeq, %518, %519 : vector<8x128xf32>
    %cst_251 = arith.constant 0.000000e+00 : f32
    %521 = vector.broadcast %cst_251 : f32 to vector<8x128xf32>
    %522 = arith.select %520, %481, %521 : vector<8x128xi1>, vector<8x128xf32>
    %523 = arith.select %516, %479, %522 : vector<8x128xi1>, vector<8x128xf32>
    %524 = arith.mulf %511, %523 : vector<8x128xf32>
    %525 = arith.addf %509, %524 : vector<8x128xf32>
    %c19_252 = arith.constant 19 : index
    %c0_253 = arith.constant 0 : index
    %c0_254 = arith.constant 0 : index
    %526 = vector.load %arg2[%c19_252, %c0_253, %c0_254] : memref<36x8x128xf32, #tpu.memory_space<vmem>>, vector<1x8x128xf32>
    %527 = vector.shape_cast %526 : vector<1x8x128xf32> to vector<8x128xf32>
    %528 = arith.subf %527, %507 : vector<8x128xf32>
    %529 = math.exp %528 : vector<8x128xf32>
    %530 = arith.addf %514, %529 : vector<8x128xf32>
    %cst_255 = arith.constant 1.000000e+00 : f32
    %531 = vector.broadcast %cst_255 : f32 to vector<8x128xf32>
    %532 = arith.cmpf oeq, %476, %531 : vector<8x128xf32>
    %cst_256 = arith.constant 1.000000e+00 : f32
    %533 = vector.broadcast %cst_256 : f32 to vector<8x128xf32>
    %534 = arith.addf %476, %533 : vector<8x128xf32>
    %cst_257 = arith.constant 1.000000e+00 : f32
    %535 = vector.broadcast %cst_257 : f32 to vector<8x128xf32>
    %536 = arith.cmpf oeq, %534, %535 : vector<8x128xf32>
    %cst_258 = arith.constant 0.000000e+00 : f32
    %537 = vector.broadcast %cst_258 : f32 to vector<8x128xf32>
    %538 = arith.select %536, %481, %537 : vector<8x128xi1>, vector<8x128xf32>
    %539 = arith.select %532, %479, %538 : vector<8x128xi1>, vector<8x128xf32>
    %540 = arith.mulf %527, %539 : vector<8x128xf32>
    %541 = arith.addf %525, %540 : vector<8x128xf32>
    %c20_259 = arith.constant 20 : index
    %c0_260 = arith.constant 0 : index
    %c0_261 = arith.constant 0 : index
    %542 = vector.load %arg2[%c20_259, %c0_260, %c0_261] : memref<36x8x128xf32, #tpu.memory_space<vmem>>, vector<1x8x128xf32>
    %543 = vector.shape_cast %542 : vector<1x8x128xf32> to vector<8x128xf32>
    %544 = arith.subf %543, %507 : vector<8x128xf32>
    %545 = math.exp %544 : vector<8x128xf32>
    %546 = arith.addf %530, %545 : vector<8x128xf32>
    %cst_262 = arith.constant 2.000000e+00 : f32
    %547 = vector.broadcast %cst_262 : f32 to vector<8x128xf32>
    %548 = arith.cmpf oeq, %476, %547 : vector<8x128xf32>
    %cst_263 = arith.constant 1.000000e+00 : f32
    %549 = vector.broadcast %cst_263 : f32 to vector<8x128xf32>
    %550 = arith.addf %476, %549 : vector<8x128xf32>
    %cst_264 = arith.constant 2.000000e+00 : f32
    %551 = vector.broadcast %cst_264 : f32 to vector<8x128xf32>
    %552 = arith.cmpf oeq, %550, %551 : vector<8x128xf32>
    %cst_265 = arith.constant 0.000000e+00 : f32
    %553 = vector.broadcast %cst_265 : f32 to vector<8x128xf32>
    %554 = arith.select %552, %481, %553 : vector<8x128xi1>, vector<8x128xf32>
    %555 = arith.select %548, %479, %554 : vector<8x128xi1>, vector<8x128xf32>
    %556 = arith.mulf %543, %555 : vector<8x128xf32>
    %557 = arith.addf %541, %556 : vector<8x128xf32>
    %c21_266 = arith.constant 21 : index
    %c0_267 = arith.constant 0 : index
    %c0_268 = arith.constant 0 : index
    %558 = vector.load %arg2[%c21_266, %c0_267, %c0_268] : memref<36x8x128xf32, #tpu.memory_space<vmem>>, vector<1x8x128xf32>
    %559 = vector.shape_cast %558 : vector<1x8x128xf32> to vector<8x128xf32>
    %560 = arith.subf %559, %507 : vector<8x128xf32>
    %561 = math.exp %560 : vector<8x128xf32>
    %562 = arith.addf %546, %561 : vector<8x128xf32>
    %cst_269 = arith.constant 3.000000e+00 : f32
    %563 = vector.broadcast %cst_269 : f32 to vector<8x128xf32>
    %564 = arith.cmpf oeq, %476, %563 : vector<8x128xf32>
    %cst_270 = arith.constant 1.000000e+00 : f32
    %565 = vector.broadcast %cst_270 : f32 to vector<8x128xf32>
    %566 = arith.addf %476, %565 : vector<8x128xf32>
    %cst_271 = arith.constant 3.000000e+00 : f32
    %567 = vector.broadcast %cst_271 : f32 to vector<8x128xf32>
    %568 = arith.cmpf oeq, %566, %567 : vector<8x128xf32>
    %cst_272 = arith.constant 0.000000e+00 : f32
    %569 = vector.broadcast %cst_272 : f32 to vector<8x128xf32>
    %570 = arith.select %568, %481, %569 : vector<8x128xi1>, vector<8x128xf32>
    %571 = arith.select %564, %479, %570 : vector<8x128xi1>, vector<8x128xf32>
    %572 = arith.mulf %559, %571 : vector<8x128xf32>
    %573 = arith.addf %557, %572 : vector<8x128xf32>
    %c22_273 = arith.constant 22 : index
    %c0_274 = arith.constant 0 : index
    %c0_275 = arith.constant 0 : index
    %574 = vector.load %arg2[%c22_273, %c0_274, %c0_275] : memref<36x8x128xf32, #tpu.memory_space<vmem>>, vector<1x8x128xf32>
    %575 = vector.shape_cast %574 : vector<1x8x128xf32> to vector<8x128xf32>
    %576 = arith.subf %575, %507 : vector<8x128xf32>
    %577 = math.exp %576 : vector<8x128xf32>
    %578 = arith.addf %562, %577 : vector<8x128xf32>
    %cst_276 = arith.constant 4.000000e+00 : f32
    %579 = vector.broadcast %cst_276 : f32 to vector<8x128xf32>
    %580 = arith.cmpf oeq, %476, %579 : vector<8x128xf32>
    %cst_277 = arith.constant 1.000000e+00 : f32
    %581 = vector.broadcast %cst_277 : f32 to vector<8x128xf32>
    %582 = arith.addf %476, %581 : vector<8x128xf32>
    %cst_278 = arith.constant 4.000000e+00 : f32
    %583 = vector.broadcast %cst_278 : f32 to vector<8x128xf32>
    %584 = arith.cmpf oeq, %582, %583 : vector<8x128xf32>
    %cst_279 = arith.constant 0.000000e+00 : f32
    %585 = vector.broadcast %cst_279 : f32 to vector<8x128xf32>
    %586 = arith.select %584, %481, %585 : vector<8x128xi1>, vector<8x128xf32>
    %587 = arith.select %580, %479, %586 : vector<8x128xi1>, vector<8x128xf32>
    %588 = arith.mulf %575, %587 : vector<8x128xf32>
    %589 = arith.addf %573, %588 : vector<8x128xf32>
    %c23_280 = arith.constant 23 : index
    %c0_281 = arith.constant 0 : index
    %c0_282 = arith.constant 0 : index
    %590 = vector.load %arg2[%c23_280, %c0_281, %c0_282] : memref<36x8x128xf32, #tpu.memory_space<vmem>>, vector<1x8x128xf32>
    %591 = vector.shape_cast %590 : vector<1x8x128xf32> to vector<8x128xf32>
    %592 = arith.subf %591, %507 : vector<8x128xf32>
    %593 = math.exp %592 : vector<8x128xf32>
    %594 = arith.addf %578, %593 : vector<8x128xf32>
    %cst_283 = arith.constant 5.000000e+00 : f32
    %595 = vector.broadcast %cst_283 : f32 to vector<8x128xf32>
    %596 = arith.cmpf oeq, %476, %595 : vector<8x128xf32>
    %cst_284 = arith.constant 1.000000e+00 : f32
    %597 = vector.broadcast %cst_284 : f32 to vector<8x128xf32>
    %598 = arith.addf %476, %597 : vector<8x128xf32>
    %cst_285 = arith.constant 5.000000e+00 : f32
    %599 = vector.broadcast %cst_285 : f32 to vector<8x128xf32>
    %600 = arith.cmpf oeq, %598, %599 : vector<8x128xf32>
    %cst_286 = arith.constant 0.000000e+00 : f32
    %601 = vector.broadcast %cst_286 : f32 to vector<8x128xf32>
    %602 = arith.select %600, %481, %601 : vector<8x128xi1>, vector<8x128xf32>
    %603 = arith.select %596, %479, %602 : vector<8x128xi1>, vector<8x128xf32>
    %604 = arith.mulf %591, %603 : vector<8x128xf32>
    %605 = arith.addf %589, %604 : vector<8x128xf32>
    %c24_287 = arith.constant 24 : index
    %c0_288 = arith.constant 0 : index
    %c0_289 = arith.constant 0 : index
    %606 = vector.load %arg2[%c24_287, %c0_288, %c0_289] : memref<36x8x128xf32, #tpu.memory_space<vmem>>, vector<1x8x128xf32>
    %607 = vector.shape_cast %606 : vector<1x8x128xf32> to vector<8x128xf32>
    %608 = arith.subf %607, %507 : vector<8x128xf32>
    %609 = math.exp %608 : vector<8x128xf32>
    %610 = arith.addf %594, %609 : vector<8x128xf32>
    %cst_290 = arith.constant 6.000000e+00 : f32
    %611 = vector.broadcast %cst_290 : f32 to vector<8x128xf32>
    %612 = arith.cmpf oeq, %476, %611 : vector<8x128xf32>
    %cst_291 = arith.constant 1.000000e+00 : f32
    %613 = vector.broadcast %cst_291 : f32 to vector<8x128xf32>
    %614 = arith.addf %476, %613 : vector<8x128xf32>
    %cst_292 = arith.constant 6.000000e+00 : f32
    %615 = vector.broadcast %cst_292 : f32 to vector<8x128xf32>
    %616 = arith.cmpf oeq, %614, %615 : vector<8x128xf32>
    %cst_293 = arith.constant 0.000000e+00 : f32
    %617 = vector.broadcast %cst_293 : f32 to vector<8x128xf32>
    %618 = arith.select %616, %481, %617 : vector<8x128xi1>, vector<8x128xf32>
    %619 = arith.select %612, %479, %618 : vector<8x128xi1>, vector<8x128xf32>
    %620 = arith.mulf %607, %619 : vector<8x128xf32>
    %621 = arith.addf %605, %620 : vector<8x128xf32>
    %c25_294 = arith.constant 25 : index
    %c0_295 = arith.constant 0 : index
    %c0_296 = arith.constant 0 : index
    %622 = vector.load %arg2[%c25_294, %c0_295, %c0_296] : memref<36x8x128xf32, #tpu.memory_space<vmem>>, vector<1x8x128xf32>
    %623 = vector.shape_cast %622 : vector<1x8x128xf32> to vector<8x128xf32>
    %624 = arith.subf %623, %507 : vector<8x128xf32>
    %625 = math.exp %624 : vector<8x128xf32>
    %626 = arith.addf %610, %625 : vector<8x128xf32>
    %cst_297 = arith.constant 7.000000e+00 : f32
    %627 = vector.broadcast %cst_297 : f32 to vector<8x128xf32>
    %628 = arith.cmpf oeq, %476, %627 : vector<8x128xf32>
    %cst_298 = arith.constant 1.000000e+00 : f32
    %629 = vector.broadcast %cst_298 : f32 to vector<8x128xf32>
    %630 = arith.addf %476, %629 : vector<8x128xf32>
    %cst_299 = arith.constant 7.000000e+00 : f32
    %631 = vector.broadcast %cst_299 : f32 to vector<8x128xf32>
    %632 = arith.cmpf oeq, %630, %631 : vector<8x128xf32>
    %cst_300 = arith.constant 0.000000e+00 : f32
    %633 = vector.broadcast %cst_300 : f32 to vector<8x128xf32>
    %634 = arith.select %632, %481, %633 : vector<8x128xi1>, vector<8x128xf32>
    %635 = arith.select %628, %479, %634 : vector<8x128xi1>, vector<8x128xf32>
    %636 = arith.mulf %623, %635 : vector<8x128xf32>
    %637 = arith.addf %621, %636 : vector<8x128xf32>
    %c26_301 = arith.constant 26 : index
    %c0_302 = arith.constant 0 : index
    %c0_303 = arith.constant 0 : index
    %638 = vector.load %arg2[%c26_301, %c0_302, %c0_303] : memref<36x8x128xf32, #tpu.memory_space<vmem>>, vector<1x8x128xf32>
    %639 = vector.shape_cast %638 : vector<1x8x128xf32> to vector<8x128xf32>
    %640 = arith.subf %639, %507 : vector<8x128xf32>
    %641 = math.exp %640 : vector<8x128xf32>
    %642 = arith.addf %626, %641 : vector<8x128xf32>
    %cst_304 = arith.constant 8.000000e+00 : f32
    %643 = vector.broadcast %cst_304 : f32 to vector<8x128xf32>
    %644 = arith.cmpf oeq, %476, %643 : vector<8x128xf32>
    %cst_305 = arith.constant 1.000000e+00 : f32
    %645 = vector.broadcast %cst_305 : f32 to vector<8x128xf32>
    %646 = arith.addf %476, %645 : vector<8x128xf32>
    %cst_306 = arith.constant 8.000000e+00 : f32
    %647 = vector.broadcast %cst_306 : f32 to vector<8x128xf32>
    %648 = arith.cmpf oeq, %646, %647 : vector<8x128xf32>
    %cst_307 = arith.constant 0.000000e+00 : f32
    %649 = vector.broadcast %cst_307 : f32 to vector<8x128xf32>
    %650 = arith.select %648, %481, %649 : vector<8x128xi1>, vector<8x128xf32>
    %651 = arith.select %644, %479, %650 : vector<8x128xi1>, vector<8x128xf32>
    %652 = arith.mulf %639, %651 : vector<8x128xf32>
    %653 = arith.addf %637, %652 : vector<8x128xf32>
    %654 = math.log %642 : vector<8x128xf32>
    %655 = arith.addf %507, %654 : vector<8x128xf32>
    %656 = arith.addf %475, %655 : vector<8x128xf32>
    %657 = arith.subf %656, %653 : vector<8x128xf32>
    %658 = math.floor %110 : vector<8x128xf32>
    %cst_308 = arith.constant 1.000000e+00 : f32
    %659 = vector.broadcast %cst_308 : f32 to vector<8x128xf32>
    %660 = arith.addf %658, %659 : vector<8x128xf32>
    %661 = arith.subf %660, %110 : vector<8x128xf32>
    %cst_309 = arith.constant 1.000000e+00 : f32
    %662 = vector.broadcast %cst_309 : f32 to vector<8x128xf32>
    %663 = arith.subf %662, %661 : vector<8x128xf32>
    %c27 = arith.constant 27 : index
    %c0_310 = arith.constant 0 : index
    %c0_311 = arith.constant 0 : index
    %664 = vector.load %arg2[%c27, %c0_310, %c0_311] : memref<36x8x128xf32, #tpu.memory_space<vmem>>, vector<1x8x128xf32>
    %665 = vector.shape_cast %664 : vector<1x8x128xf32> to vector<8x128xf32>
    %c28 = arith.constant 28 : index
    %c0_312 = arith.constant 0 : index
    %c0_313 = arith.constant 0 : index
    %666 = vector.load %arg2[%c28, %c0_312, %c0_313] : memref<36x8x128xf32, #tpu.memory_space<vmem>>, vector<1x8x128xf32>
    %667 = vector.shape_cast %666 : vector<1x8x128xf32> to vector<8x128xf32>
    %668 = arith.maximumf %665, %667 : vector<8x128xf32>
    %c29 = arith.constant 29 : index
    %c0_314 = arith.constant 0 : index
    %c0_315 = arith.constant 0 : index
    %669 = vector.load %arg2[%c29, %c0_314, %c0_315] : memref<36x8x128xf32, #tpu.memory_space<vmem>>, vector<1x8x128xf32>
    %670 = vector.shape_cast %669 : vector<1x8x128xf32> to vector<8x128xf32>
    %671 = arith.maximumf %668, %670 : vector<8x128xf32>
    %c30 = arith.constant 30 : index
    %c0_316 = arith.constant 0 : index
    %c0_317 = arith.constant 0 : index
    %672 = vector.load %arg2[%c30, %c0_316, %c0_317] : memref<36x8x128xf32, #tpu.memory_space<vmem>>, vector<1x8x128xf32>
    %673 = vector.shape_cast %672 : vector<1x8x128xf32> to vector<8x128xf32>
    %674 = arith.maximumf %671, %673 : vector<8x128xf32>
    %c31 = arith.constant 31 : index
    %c0_318 = arith.constant 0 : index
    %c0_319 = arith.constant 0 : index
    %675 = vector.load %arg2[%c31, %c0_318, %c0_319] : memref<36x8x128xf32, #tpu.memory_space<vmem>>, vector<1x8x128xf32>
    %676 = vector.shape_cast %675 : vector<1x8x128xf32> to vector<8x128xf32>
    %677 = arith.maximumf %674, %676 : vector<8x128xf32>
    %c32 = arith.constant 32 : index
    %c0_320 = arith.constant 0 : index
    %c0_321 = arith.constant 0 : index
    %678 = vector.load %arg2[%c32, %c0_320, %c0_321] : memref<36x8x128xf32, #tpu.memory_space<vmem>>, vector<1x8x128xf32>
    %679 = vector.shape_cast %678 : vector<1x8x128xf32> to vector<8x128xf32>
    %680 = arith.maximumf %677, %679 : vector<8x128xf32>
    %c33 = arith.constant 33 : index
    %c0_322 = arith.constant 0 : index
    %c0_323 = arith.constant 0 : index
    %681 = vector.load %arg2[%c33, %c0_322, %c0_323] : memref<36x8x128xf32, #tpu.memory_space<vmem>>, vector<1x8x128xf32>
    %682 = vector.shape_cast %681 : vector<1x8x128xf32> to vector<8x128xf32>
    %683 = arith.maximumf %680, %682 : vector<8x128xf32>
    %c34 = arith.constant 34 : index
    %c0_324 = arith.constant 0 : index
    %c0_325 = arith.constant 0 : index
    %684 = vector.load %arg2[%c34, %c0_324, %c0_325] : memref<36x8x128xf32, #tpu.memory_space<vmem>>, vector<1x8x128xf32>
    %685 = vector.shape_cast %684 : vector<1x8x128xf32> to vector<8x128xf32>
    %686 = arith.maximumf %683, %685 : vector<8x128xf32>
    %c35 = arith.constant 35 : index
    %c0_326 = arith.constant 0 : index
    %c0_327 = arith.constant 0 : index
    %687 = vector.load %arg2[%c35, %c0_326, %c0_327] : memref<36x8x128xf32, #tpu.memory_space<vmem>>, vector<1x8x128xf32>
    %688 = vector.shape_cast %687 : vector<1x8x128xf32> to vector<8x128xf32>
    %689 = arith.maximumf %686, %688 : vector<8x128xf32>
    %cst_328 = arith.constant 0.000000e+00 : f32
    %690 = vector.broadcast %cst_328 : f32 to vector<8x128xf32>
    %cst_329 = arith.constant 0.000000e+00 : f32
    %691 = vector.broadcast %cst_329 : f32 to vector<8x128xf32>
    %c27_330 = arith.constant 27 : index
    %c0_331 = arith.constant 0 : index
    %c0_332 = arith.constant 0 : index
    %692 = vector.load %arg2[%c27_330, %c0_331, %c0_332] : memref<36x8x128xf32, #tpu.memory_space<vmem>>, vector<1x8x128xf32>
    %693 = vector.shape_cast %692 : vector<1x8x128xf32> to vector<8x128xf32>
    %694 = arith.subf %693, %689 : vector<8x128xf32>
    %695 = math.exp %694 : vector<8x128xf32>
    %696 = arith.addf %690, %695 : vector<8x128xf32>
    %cst_333 = arith.constant 0.000000e+00 : f32
    %697 = vector.broadcast %cst_333 : f32 to vector<8x128xf32>
    %698 = arith.cmpf oeq, %658, %697 : vector<8x128xf32>
    %cst_334 = arith.constant 1.000000e+00 : f32
    %699 = vector.broadcast %cst_334 : f32 to vector<8x128xf32>
    %700 = arith.addf %658, %699 : vector<8x128xf32>
    %cst_335 = arith.constant 0.000000e+00 : f32
    %701 = vector.broadcast %cst_335 : f32 to vector<8x128xf32>
    %702 = arith.cmpf oeq, %700, %701 : vector<8x128xf32>
    %cst_336 = arith.constant 0.000000e+00 : f32
    %703 = vector.broadcast %cst_336 : f32 to vector<8x128xf32>
    %704 = arith.select %702, %663, %703 : vector<8x128xi1>, vector<8x128xf32>
    %705 = arith.select %698, %661, %704 : vector<8x128xi1>, vector<8x128xf32>
    %706 = arith.mulf %693, %705 : vector<8x128xf32>
    %707 = arith.addf %691, %706 : vector<8x128xf32>
    %c28_337 = arith.constant 28 : index
    %c0_338 = arith.constant 0 : index
    %c0_339 = arith.constant 0 : index
    %708 = vector.load %arg2[%c28_337, %c0_338, %c0_339] : memref<36x8x128xf32, #tpu.memory_space<vmem>>, vector<1x8x128xf32>
    %709 = vector.shape_cast %708 : vector<1x8x128xf32> to vector<8x128xf32>
    %710 = arith.subf %709, %689 : vector<8x128xf32>
    %711 = math.exp %710 : vector<8x128xf32>
    %712 = arith.addf %696, %711 : vector<8x128xf32>
    %cst_340 = arith.constant 1.000000e+00 : f32
    %713 = vector.broadcast %cst_340 : f32 to vector<8x128xf32>
    %714 = arith.cmpf oeq, %658, %713 : vector<8x128xf32>
    %cst_341 = arith.constant 1.000000e+00 : f32
    %715 = vector.broadcast %cst_341 : f32 to vector<8x128xf32>
    %716 = arith.addf %658, %715 : vector<8x128xf32>
    %cst_342 = arith.constant 1.000000e+00 : f32
    %717 = vector.broadcast %cst_342 : f32 to vector<8x128xf32>
    %718 = arith.cmpf oeq, %716, %717 : vector<8x128xf32>
    %cst_343 = arith.constant 0.000000e+00 : f32
    %719 = vector.broadcast %cst_343 : f32 to vector<8x128xf32>
    %720 = arith.select %718, %663, %719 : vector<8x128xi1>, vector<8x128xf32>
    %721 = arith.select %714, %661, %720 : vector<8x128xi1>, vector<8x128xf32>
    %722 = arith.mulf %709, %721 : vector<8x128xf32>
    %723 = arith.addf %707, %722 : vector<8x128xf32>
    %c29_344 = arith.constant 29 : index
    %c0_345 = arith.constant 0 : index
    %c0_346 = arith.constant 0 : index
    %724 = vector.load %arg2[%c29_344, %c0_345, %c0_346] : memref<36x8x128xf32, #tpu.memory_space<vmem>>, vector<1x8x128xf32>
    %725 = vector.shape_cast %724 : vector<1x8x128xf32> to vector<8x128xf32>
    %726 = arith.subf %725, %689 : vector<8x128xf32>
    %727 = math.exp %726 : vector<8x128xf32>
    %728 = arith.addf %712, %727 : vector<8x128xf32>
    %cst_347 = arith.constant 2.000000e+00 : f32
    %729 = vector.broadcast %cst_347 : f32 to vector<8x128xf32>
    %730 = arith.cmpf oeq, %658, %729 : vector<8x128xf32>
    %cst_348 = arith.constant 1.000000e+00 : f32
    %731 = vector.broadcast %cst_348 : f32 to vector<8x128xf32>
    %732 = arith.addf %658, %731 : vector<8x128xf32>
    %cst_349 = arith.constant 2.000000e+00 : f32
    %733 = vector.broadcast %cst_349 : f32 to vector<8x128xf32>
    %734 = arith.cmpf oeq, %732, %733 : vector<8x128xf32>
    %cst_350 = arith.constant 0.000000e+00 : f32
    %735 = vector.broadcast %cst_350 : f32 to vector<8x128xf32>
    %736 = arith.select %734, %663, %735 : vector<8x128xi1>, vector<8x128xf32>
    %737 = arith.select %730, %661, %736 : vector<8x128xi1>, vector<8x128xf32>
    %738 = arith.mulf %725, %737 : vector<8x128xf32>
    %739 = arith.addf %723, %738 : vector<8x128xf32>
    %c30_351 = arith.constant 30 : index
    %c0_352 = arith.constant 0 : index
    %c0_353 = arith.constant 0 : index
    %740 = vector.load %arg2[%c30_351, %c0_352, %c0_353] : memref<36x8x128xf32, #tpu.memory_space<vmem>>, vector<1x8x128xf32>
    %741 = vector.shape_cast %740 : vector<1x8x128xf32> to vector<8x128xf32>
    %742 = arith.subf %741, %689 : vector<8x128xf32>
    %743 = math.exp %742 : vector<8x128xf32>
    %744 = arith.addf %728, %743 : vector<8x128xf32>
    %cst_354 = arith.constant 3.000000e+00 : f32
    %745 = vector.broadcast %cst_354 : f32 to vector<8x128xf32>
    %746 = arith.cmpf oeq, %658, %745 : vector<8x128xf32>
    %cst_355 = arith.constant 1.000000e+00 : f32
    %747 = vector.broadcast %cst_355 : f32 to vector<8x128xf32>
    %748 = arith.addf %658, %747 : vector<8x128xf32>
    %cst_356 = arith.constant 3.000000e+00 : f32
    %749 = vector.broadcast %cst_356 : f32 to vector<8x128xf32>
    %750 = arith.cmpf oeq, %748, %749 : vector<8x128xf32>
    %cst_357 = arith.constant 0.000000e+00 : f32
    %751 = vector.broadcast %cst_357 : f32 to vector<8x128xf32>
    %752 = arith.select %750, %663, %751 : vector<8x128xi1>, vector<8x128xf32>
    %753 = arith.select %746, %661, %752 : vector<8x128xi1>, vector<8x128xf32>
    %754 = arith.mulf %741, %753 : vector<8x128xf32>
    %755 = arith.addf %739, %754 : vector<8x128xf32>
    %c31_358 = arith.constant 31 : index
    %c0_359 = arith.constant 0 : index
    %c0_360 = arith.constant 0 : index
    %756 = vector.load %arg2[%c31_358, %c0_359, %c0_360] : memref<36x8x128xf32, #tpu.memory_space<vmem>>, vector<1x8x128xf32>
    %757 = vector.shape_cast %756 : vector<1x8x128xf32> to vector<8x128xf32>
    %758 = arith.subf %757, %689 : vector<8x128xf32>
    %759 = math.exp %758 : vector<8x128xf32>
    %760 = arith.addf %744, %759 : vector<8x128xf32>
    %cst_361 = arith.constant 4.000000e+00 : f32
    %761 = vector.broadcast %cst_361 : f32 to vector<8x128xf32>
    %762 = arith.cmpf oeq, %658, %761 : vector<8x128xf32>
    %cst_362 = arith.constant 1.000000e+00 : f32
    %763 = vector.broadcast %cst_362 : f32 to vector<8x128xf32>
    %764 = arith.addf %658, %763 : vector<8x128xf32>
    %cst_363 = arith.constant 4.000000e+00 : f32
    %765 = vector.broadcast %cst_363 : f32 to vector<8x128xf32>
    %766 = arith.cmpf oeq, %764, %765 : vector<8x128xf32>
    %cst_364 = arith.constant 0.000000e+00 : f32
    %767 = vector.broadcast %cst_364 : f32 to vector<8x128xf32>
    %768 = arith.select %766, %663, %767 : vector<8x128xi1>, vector<8x128xf32>
    %769 = arith.select %762, %661, %768 : vector<8x128xi1>, vector<8x128xf32>
    %770 = arith.mulf %757, %769 : vector<8x128xf32>
    %771 = arith.addf %755, %770 : vector<8x128xf32>
    %c32_365 = arith.constant 32 : index
    %c0_366 = arith.constant 0 : index
    %c0_367 = arith.constant 0 : index
    %772 = vector.load %arg2[%c32_365, %c0_366, %c0_367] : memref<36x8x128xf32, #tpu.memory_space<vmem>>, vector<1x8x128xf32>
    %773 = vector.shape_cast %772 : vector<1x8x128xf32> to vector<8x128xf32>
    %774 = arith.subf %773, %689 : vector<8x128xf32>
    %775 = math.exp %774 : vector<8x128xf32>
    %776 = arith.addf %760, %775 : vector<8x128xf32>
    %cst_368 = arith.constant 5.000000e+00 : f32
    %777 = vector.broadcast %cst_368 : f32 to vector<8x128xf32>
    %778 = arith.cmpf oeq, %658, %777 : vector<8x128xf32>
    %cst_369 = arith.constant 1.000000e+00 : f32
    %779 = vector.broadcast %cst_369 : f32 to vector<8x128xf32>
    %780 = arith.addf %658, %779 : vector<8x128xf32>
    %cst_370 = arith.constant 5.000000e+00 : f32
    %781 = vector.broadcast %cst_370 : f32 to vector<8x128xf32>
    %782 = arith.cmpf oeq, %780, %781 : vector<8x128xf32>
    %cst_371 = arith.constant 0.000000e+00 : f32
    %783 = vector.broadcast %cst_371 : f32 to vector<8x128xf32>
    %784 = arith.select %782, %663, %783 : vector<8x128xi1>, vector<8x128xf32>
    %785 = arith.select %778, %661, %784 : vector<8x128xi1>, vector<8x128xf32>
    %786 = arith.mulf %773, %785 : vector<8x128xf32>
    %787 = arith.addf %771, %786 : vector<8x128xf32>
    %c33_372 = arith.constant 33 : index
    %c0_373 = arith.constant 0 : index
    %c0_374 = arith.constant 0 : index
    %788 = vector.load %arg2[%c33_372, %c0_373, %c0_374] : memref<36x8x128xf32, #tpu.memory_space<vmem>>, vector<1x8x128xf32>
    %789 = vector.shape_cast %788 : vector<1x8x128xf32> to vector<8x128xf32>
    %790 = arith.subf %789, %689 : vector<8x128xf32>
    %791 = math.exp %790 : vector<8x128xf32>
    %792 = arith.addf %776, %791 : vector<8x128xf32>
    %cst_375 = arith.constant 6.000000e+00 : f32
    %793 = vector.broadcast %cst_375 : f32 to vector<8x128xf32>
    %794 = arith.cmpf oeq, %658, %793 : vector<8x128xf32>
    %cst_376 = arith.constant 1.000000e+00 : f32
    %795 = vector.broadcast %cst_376 : f32 to vector<8x128xf32>
    %796 = arith.addf %658, %795 : vector<8x128xf32>
    %cst_377 = arith.constant 6.000000e+00 : f32
    %797 = vector.broadcast %cst_377 : f32 to vector<8x128xf32>
    %798 = arith.cmpf oeq, %796, %797 : vector<8x128xf32>
    %cst_378 = arith.constant 0.000000e+00 : f32
    %799 = vector.broadcast %cst_378 : f32 to vector<8x128xf32>
    %800 = arith.select %798, %663, %799 : vector<8x128xi1>, vector<8x128xf32>
    %801 = arith.select %794, %661, %800 : vector<8x128xi1>, vector<8x128xf32>
    %802 = arith.mulf %789, %801 : vector<8x128xf32>
    %803 = arith.addf %787, %802 : vector<8x128xf32>
    %c34_379 = arith.constant 34 : index
    %c0_380 = arith.constant 0 : index
    %c0_381 = arith.constant 0 : index
    %804 = vector.load %arg2[%c34_379, %c0_380, %c0_381] : memref<36x8x128xf32, #tpu.memory_space<vmem>>, vector<1x8x128xf32>
    %805 = vector.shape_cast %804 : vector<1x8x128xf32> to vector<8x128xf32>
    %806 = arith.subf %805, %689 : vector<8x128xf32>
    %807 = math.exp %806 : vector<8x128xf32>
    %808 = arith.addf %792, %807 : vector<8x128xf32>
    %cst_382 = arith.constant 7.000000e+00 : f32
    %809 = vector.broadcast %cst_382 : f32 to vector<8x128xf32>
    %810 = arith.cmpf oeq, %658, %809 : vector<8x128xf32>
    %cst_383 = arith.constant 1.000000e+00 : f32
    %811 = vector.broadcast %cst_383 : f32 to vector<8x128xf32>
    %812 = arith.addf %658, %811 : vector<8x128xf32>
    %cst_384 = arith.constant 7.000000e+00 : f32
    %813 = vector.broadcast %cst_384 : f32 to vector<8x128xf32>
    %814 = arith.cmpf oeq, %812, %813 : vector<8x128xf32>
    %cst_385 = arith.constant 0.000000e+00 : f32
    %815 = vector.broadcast %cst_385 : f32 to vector<8x128xf32>
    %816 = arith.select %814, %663, %815 : vector<8x128xi1>, vector<8x128xf32>
    %817 = arith.select %810, %661, %816 : vector<8x128xi1>, vector<8x128xf32>
    %818 = arith.mulf %805, %817 : vector<8x128xf32>
    %819 = arith.addf %803, %818 : vector<8x128xf32>
    %c35_386 = arith.constant 35 : index
    %c0_387 = arith.constant 0 : index
    %c0_388 = arith.constant 0 : index
    %820 = vector.load %arg2[%c35_386, %c0_387, %c0_388] : memref<36x8x128xf32, #tpu.memory_space<vmem>>, vector<1x8x128xf32>
    %821 = vector.shape_cast %820 : vector<1x8x128xf32> to vector<8x128xf32>
    %822 = arith.subf %821, %689 : vector<8x128xf32>
    %823 = math.exp %822 : vector<8x128xf32>
    %824 = arith.addf %808, %823 : vector<8x128xf32>
    %cst_389 = arith.constant 8.000000e+00 : f32
    %825 = vector.broadcast %cst_389 : f32 to vector<8x128xf32>
    %826 = arith.cmpf oeq, %658, %825 : vector<8x128xf32>
    %cst_390 = arith.constant 1.000000e+00 : f32
    %827 = vector.broadcast %cst_390 : f32 to vector<8x128xf32>
    %828 = arith.addf %658, %827 : vector<8x128xf32>
    %cst_391 = arith.constant 8.000000e+00 : f32
    %829 = vector.broadcast %cst_391 : f32 to vector<8x128xf32>
    %830 = arith.cmpf oeq, %828, %829 : vector<8x128xf32>
    %cst_392 = arith.constant 0.000000e+00 : f32
    %831 = vector.broadcast %cst_392 : f32 to vector<8x128xf32>
    %832 = arith.select %830, %663, %831 : vector<8x128xi1>, vector<8x128xf32>
    %833 = arith.select %826, %661, %832 : vector<8x128xi1>, vector<8x128xf32>
    %834 = arith.mulf %821, %833 : vector<8x128xf32>
    %835 = arith.addf %819, %834 : vector<8x128xf32>
    %836 = math.log %824 : vector<8x128xf32>
    %837 = arith.addf %689, %836 : vector<8x128xf32>
    %838 = arith.addf %657, %837 : vector<8x128xf32>
    %839 = arith.subf %838, %835 : vector<8x128xf32>
    %cst_393 = arith.constant 2.500000e-01 : f32
    %840 = vector.broadcast %cst_393 : f32 to vector<8x128xf32>
    %841 = arith.mulf %839, %840 : vector<8x128xf32>
    %cst_394 = arith.constant dense<0.000000e+00> : vector<128xf32>
    %842 = vector.multi_reduction <add>, %90, %cst_394 [0] : vector<8x128xf32> to vector<128xf32>
    %843 = vector.shape_cast %842 : vector<128xf32> to vector<1x128xf32>
    %c0_395 = arith.constant 0 : index
    %c0_396 = arith.constant 0 : index
    %c0_397 = arith.constant 0 : index
    %844 = vector.load %arg3[%c0_395, %c0_396, %c0_397] : memref<1x1x128xf32, #tpu.memory_space<vmem>>, vector<1x1x128xf32>
    %845 = vector.shape_cast %844 : vector<1x1x128xf32> to vector<1x128xf32>
    %846 = vector.shape_cast %843 : vector<1x128xf32> to vector<1x1x128xf32>
    tpu.vector_store %arg3[%c0_395, %c0_396, %c0_397], %846 {strides = array<i32>} : memref<1x1x128xf32, #tpu.memory_space<vmem>>, vector<1x1x128xf32>,
    %847 = arith.mulf %841, %21 : vector<8x128xf32>
    %cst_398 = arith.constant dense<0.000000e+00> : vector<128xf32>
    %848 = vector.multi_reduction <add>, %847, %cst_398 [0] : vector<8x128xf32> to vector<128xf32>
    %849 = vector.shape_cast %848 : vector<128xf32> to vector<1x128xf32>
    %c0_399 = arith.constant 0 : index
    %c0_400 = arith.constant 0 : index
    %c0_401 = arith.constant 0 : index
    %850 = vector.load %arg4[%c0_399, %c0_400, %c0_401] : memref<1x1x128xf32, #tpu.memory_space<vmem>>, vector<1x1x128xf32>
    %851 = vector.shape_cast %850 : vector<1x1x128xf32> to vector<1x128xf32>
    %852 = vector.shape_cast %849 : vector<1x128xf32> to vector<1x1x128xf32>
    tpu.vector_store %arg4[%c0_399, %c0_400, %c0_401], %852 {strides = array<i32>} : memref<1x1x128xf32, #tpu.memory_space<vmem>>, vector<1x1x128xf32>,
    return
  }
  func.func @transform_0(%arg0: i32) -> (i32, i32, i32) {
    %c0_i32 = arith.constant 0 : i32
    %c0_i32_0 = arith.constant 0 : i32
    %c0_i32_1 = arith.constant 0 : i32
    return %c0_i32, %arg0, %c0_i32_0 : i32, i32, i32
  }
  func.func @transform_1(%arg0: i32) -> (i32, i32, i32) {
    %c0_i32 = arith.constant 0 : i32
    %c0_i32_0 = arith.constant 0 : i32
    %c0_i32_1 = arith.constant 0 : i32
    return %c0_i32, %arg0, %c0_i32_0 : i32, i32, i32
  }
  func.func @transform_2(%arg0: i32) -> (i32, i32, i32) {
    %c0_i32 = arith.constant 0 : i32
    %c0_i32_0 = arith.constant 0 : i32
    %c0_i32_1 = arith.constant 0 : i32
    return %arg0, %c0_i32, %c0_i32_0 : i32, i32, i32
  }
  func.func @transform_3(%arg0: i32) -> (i32, i32, i32) {
    %c0_i32 = arith.constant 0 : i32
    %c0_i32_0 = arith.constant 0 : i32
    %c0_i32_1 = arith.constant 0 : i32
    return %arg0, %c0_i32, %c0_i32_0 : i32, i32, i32
  }
}

</mosaic_0001>

<bundles_post_ra>
// kernel: box_loss.1
= control target key start
LH: loop header
LB: loop body
LE: loop exit
PB: predicated region body
PF: predicated region fallthrough
CT: control target
= control target key end

     0   :  { %s1769_s0 = inlined_call_operand.vmem [shape: f32[11,8,128], index: 0, kind: input, shape index: {}]   ;;  %s1770_s1 = inlined_call_operand.vmem [shape: f32[36,8,128], index: 1, kind: input, shape index: {}]   ;;  %s1771_s2 = inlined_call_operand.vmem [shape: f32[1,1,128], index: 2, kind: output, shape index: {0}]   ;;  %s1772_s3 = inlined_call_operand.vmem [shape: f32[1,1,128], index: 3, kind: output, shape index: {1}]  }
   0x1   :  { %v13_v0 = vld [vmem:[%s1769_s0] sm:$0xff]  ;;  %v794_v1 = vld [vmem:[%s1769_s0 + $0x8] sm:$0xff]  ;;  %v795_v2 = vld [vmem:[%s1769_s0 + $0x10] sm:$0xff] }
   0x2   :  { %v796_v3 = vld [vmem:[%s1769_s0 + $0x18] sm:$0xff]  ;;  %v968_v4 = vld [vmem:[%s1769_s0 + $0x20] sm:$0xff]  ;;  %v973_v5 = vld [vmem:[%s1769_s0 + $0x28] sm:$0xff]  ;;  %v975_v6 = vsub.f32 %v795_v2, %v13_v0 }
   0x3   :  { %v980_v7 = vld [vmem:[%s1769_s0 + $0x30] sm:$0xff]  ;;  %v985_v8 = vld [vmem:[%s1769_s0 + $0x38] sm:$0xff]  ;;  %v35_v9 = vsub.f32 %v796_v3, %v794_v1  ;;  %v41_v10 = vmax.f32 %v13_v0, %v968_v4  ;;  %v45_v11 = vmax.f32 %v794_v1, %v973_v5  ;;  %v70_v12 = vmin.f32 %v13_v0, %v968_v4 }
   0x4   :  { %v992_v13 = vsub.f32 %v980_v7, %v968_v4  ;;  %v38_v14 = vsub.f32 %v985_v8, %v973_v5  ;;  %v40_v15 = vmin.f32 %v795_v2, %v980_v7  ;;  %v44_v16 = vmin.f32 %v796_v3, %v985_v8  ;;  %v1108_v58 = vld [vmem:[%s1770_s1 + $0x70] sm:$0xff] }
   0x5   :  { %v36_v17 = vadd.f32 1e-07, %v35_v9  ;;  %v69_v18 = vmax.f32 %v795_v2, %v980_v7  ;;  %v72_v19 = vmax.f32 %v796_v3, %v985_v8  ;;  %v73_v20 = vmin.f32 %v794_v1, %v973_v5 }
   0x6   :  { %v39_v21 = vadd.f32 1e-07, %v38_v14  ;;  %v42_v22 = vsub.f32 %v40_v15, %v41_v10  ;;  %v46_v23 = vsub.f32 %v44_v16, %v45_v11  ;;  %v79_v24 = vadd.f32 %v980_v7, %v968_v4 }
   0x7   :  { %v49_v25 = vmul.f32 %v36_v17, %v975_v6  ;;  %v71_v26 = vsub.f32 %v69_v18, %v70_v12  ;;  %v74_v27 = vsub.f32 %v72_v19, %v73_v20  ;;  %v83_v28 = vadd.f32 %v985_v8, %v973_v5 }
   0x8   :  { %v43_v29 = vmax.f32 %v42_v22, 0.0  ;;  %v47_v30 = vmax.f32 %v46_v23, 0.0  ;;  %v50_v31 = vmul.f32 %v39_v21, %v992_v13  ;;  %v80_v32 = vsub.f32 %v79_v24, %v13_v0 }
   0x9   :  { %v75_v33 = vmul.f32 %v71_v26, %v71_v26  ;;  %v76_v34 = vmul.f32 %v74_v27, %v74_v27  ;;  %v84_v35 = vsub.f32 %v83_v28, %v794_v1  ;;  %839 = vrcp.f32 %v39_v21  ;;  %v1049_v27 = vld [vmem:[%s1770_s1 + $0x10] sm:$0xff]  ;;  %v1054_v28 = vld [vmem:[%s1770_s1 + $0x48] sm:$0xff] }
   0xa   :  { %v48_v36 = vmul.f32 %v47_v30, %v43_v29  ;;  %v51_v37 = vadd.f32 %v50_v31, %v49_v25  ;;  %v81_v38 = vsub.f32 %v80_v32, %v795_v2  ;;  %841 = vrcp.f32 %v36_v17  ;;  %v1037_v25 = vld [vmem:[%s1770_s1] sm:$0xff]  ;;  %v1059_v29 = vld [vmem:[%s1770_s1 + $0x50] sm:$0xff]  ;;  %v1067_v32 = vld [vmem:[%s1770_s1 + $0x18] sm:$0xff] }
   0xb   :  { %v1007_v39 = vadd.f32 %v76_v34, %v75_v33  ;;  %v85_v40 = vsub.f32 %v84_v35, %v796_v3  ;;  %v98_v49 = vand.u32 2147483647, %v39_v21  ;;  %v100_v50 = vand.u32 2147483648, %v39_v21  ;;  %v1072_v33 = vld [vmem:[%s1770_s1 + $0x58] sm:$0xff] }
   0xc   :  { %v52_v41 = vsub.f32 %v51_v37, %v48_v36  ;;  %v82_v42 = vmul.f32 %v81_v38, %v81_v38  ;;  %vm94_vm0 = vweird.f32 %v39_v21  ;;  %v163_v53 = vand.u32 2147483647, %v36_v17 }
   0xd   :  { %v86_v43 = vmul.f32 %v85_v40, %v85_v40  ;;  %v165_v54 = vand.u32 2147483648, %v36_v17  ;;  %vm159_vm2 = vweird.f32 %v36_v17  ;;  %vm99_vm5 = vcmp.eq.f32.partialorder %v98_v49, 8.507059e+37  ;;  %v1079_v40 = vld [vmem:[%s1770_s1 + $0x20] sm:$0xff]  ;;  %v1096_v49 = vld [vmem:[%s1770_s1 + $0x68] sm:$0xff] }
   0xe   :  { %v53_v44 = vadd.f32 1e-07, %v52_v41  ;;  %v101_v59 = vor.u32 1.1754944e-38, %v100_v50  ;;  %vm164_vm8 = vcmp.eq.f32.partialorder %v163_v53, 8.507059e+37  ;;  %v403_v31 = vmax.f32 %v1054_v28, %v1059_v29  ;;  %v1084_v41 = vld [vmem:[%s1770_s1 + $0x60] sm:$0xff] }
   0xf   :  { %v840_v45 = vpop.eup %839  ;;  %v1009_v46 = vadd.f32 %v86_v43, %v82_v42  ;;  %v166_v1 = vor.u32 1.1754944e-38, %v165_v54 }
  0x10   :  { %843 = vrcp.f32 %v53_v44  ;;  %v90_v47 = vmul.f32 %v840_v45, %v39_v21  ;;  %v842_v48 = vpop.eup %841  ;;  %vm95_vm1 = vweird.f32 %v840_v45  ;;  %vm59_vm6 = vweird.f32 %v53_v44 }
  0x11   :  { %v155_v52 = vmul.f32 %v842_v48, %v36_v17  ;;  %vm160_vm3 = vweird.f32 %v842_v48  ;;  %vm1011_vm4 = vmor %vm94_vm0, %vm95_vm1  ;;  %v63_v63 = vand.u32 2147483647, %v53_v44  ;;  %v65_v0 = vand.u32 2147483648, %v53_v44 }
  0x12   :  { %v91_v51 = vsub.f32 1.0, %v90_v47  ;;  %vm161_vm7 = vmor %vm159_vm2, %vm160_vm3  ;;  %v406_v37 = vmax.f32 %v403_v31, %v1072_v33  ;;  %v1157_v31 = vld [vmem:[%s1770_s1 + $0x88] sm:$0xff] }
  0x13   :  { %v156_v56 = vsub.f32 1.0, %v155_v52  ;;  %v66_v15 = vor.u32 1.1754944e-38, %v65_v0  ;;  %vm64_vm11 = vcmp.eq.f32.partialorder %v63_v63, 8.507059e+37 }
  0x14   :  { %v92_v55 = vmul.f32 %v840_v45, %v91_v51  ;;  %v409_v43 = vmax.f32 %v406_v37, %v1084_v41  ;;  %v1168_v37 = vld [vmem:[%s1769_s0 + $0x40] sm:$0xff] }
  0x15   :  { %v157_v62 = vmul.f32 %v842_v48, %v156_v56 }
  0x16   :  { %v844_v57 = vpop.eup %843  ;;  %v93_v61 = vadd.f32 %v840_v45, %v92_v55  ;;  %v412_v53 = vmax.f32 %v409_v43, %v1096_v49 }
  0x17   :  { %v55_v60 = vmul.f32 %v844_v57, %v53_v44  ;;  %vm60_vm9 = vweird.f32 %v844_v57  ;;  %v158_v9 = vadd.f32 %v842_v48, %v157_v62 }
  0x18   :  { %v97_v3 = vsel %vm1011_vm4, %v840_v45, %v93_v61  ;;  %vm61_vm10 = vmor %vm59_vm6, %vm60_vm9  ;;  %v415_v62 = vmax.f32 %v412_v53, %v1108_v58  ;;  %v259_v53 = vsub.f32 %v1168_v37, %v968_v4 }
  0x19   :  { %v56_v2 = vsub.f32 1.0, %v55_v60  ;;  %v102_v10 = vsel %vm99_vm5, %v101_v59, %v97_v3  ;;  %v162_v14 = vsel %vm161_vm7, %v842_v48, %v158_v9  ;;  %v1091_v48 = vld [vmem:[%s1770_s1 + $0x28] sm:$0xff] }
  0x1a   :  { %v1018_v12 = vmul.f32 %v102_v10, %v992_v13  ;;  %v167_v16 = vsel %vm164_vm8, %v166_v1, %v162_v14  ;;  %v1121_v1 = vld [vmem:[%s1770_s1 + $0x38] sm:$0xff] }
  0x1b   :  { %v57_v11 = vmul.f32 %v844_v57, %v56_v2  ;;  %v1025_v19 = vmul.f32 %v167_v16, %v975_v6  ;;  %v1042_v6 = vld [vmem:[%s1770_s1 + $0x8] sm:$0xff]  ;;  %v1126_v2 = vld [vmem:[%s1770_s1 + $0x78] sm:$0xff] }
  0x1c   :  { %v1022_v18 = vand.u32 2147483647, %v1018_v12  ;;  %v278_v26 = vmax.f32 %v1037_v25, %v1042_v6  ;;  %v418_v10 = vmax.f32 %v415_v62, %v1126_v2 }
  0x1d   :  { %v58_v17 = vadd.f32 %v844_v57, %v57_v11  ;;  %v1029_v22 = vand.u32 2147483647, %v1025_v19 }
  0x1e   :  { %v106_v21 = vmax.f32 %v1022_v18, 1.0  ;;  %v281_v30 = vmax.f32 %v278_v26, %v1049_v27  ;;  %v105_v63 = vmin.f32 %v1022_v18, 1.0 }
  0x1f   :  { %v62_v20 = vsel %vm61_vm10, %v844_v57, %v58_v17  ;;  %v171_v24 = vmax.f32 %v1029_v22, 1.0  ;;  %v1103_v57 = vld [vmem:[%s1770_s1 + $0x30] sm:$0xff]  ;;  %v170_v14 = vmin.f32 %v1029_v22, 1.0  ;;  %v1141_v17 = vld [vmem:[%s1770_s1 + $0x40] sm:$0xff] }
  0x20   :  { %v67_v13 = vsel %vm64_vm11, %v66_v15, %v62_v20  ;;  %845 = vrcp.f32 %v106_v21  ;;  %v118_v35 = vand.u32 2147483648, %v106_v21  ;;  %vm112_vm12 = vweird.f32 %v106_v21  ;;  %v1146_v20 = vld [vmem:[%s1770_s1 + $0x80] sm:$0xff] }
  0x21   :  { %v1031_v23 = vmul.f32 %v67_v13, %v48_v36  ;;  %847 = vrcp.f32 %v171_v24  ;;  %v284_v36 = vmax.f32 %v281_v30, %v1067_v32  ;;  %v116_v47 = vand.u32 2147483647, %v106_v21 }
  0x22   :  { %v119_v50 = vor.u32 1.1754944e-38, %v118_v35  ;;  %vm177_vm14 = vweird.f32 %v171_v24  ;;  %v181_v55 = vand.u32 2147483647, %v171_v24  ;;  %v183_v56 = vand.u32 2147483648, %v171_v24 }
  0x23   :  { %v287_v42 = vmax.f32 %v284_v36, %v1079_v40  ;;  %vm117_vm1 = vcmp.eq.f32.partialorder %v116_v47, 8.507059e+37  ;;  %v421_v26 = vmax.f32 %v418_v10, %v1146_v20 }
  0x24   :  { %vm182_vm3 = vcmp.eq.f32.partialorder %v181_v55, 8.507059e+37  ;;  %v184_v16 = vor.u32 1.1754944e-38, %v183_v56  ;;  %v1191_v55 = vld [vmem:[%s1769_s0 + $0x48] sm:$0xff] }
  0x25   :  { %v290_v52 = vmax.f32 %v287_v42, %v1091_v48  ;;  %v1175_v43 = vmax.f32 %v421_v26, %v1157_v31  ;;  %v262_v10 = vsub.f32 %v1191_v55, %v973_v5  ;;  %v265_v5 = vsub.f32 %v980_v7, %v1168_v37 }
  0x26   :  { %v846_v34 = vpop.eup %845 }
  0x27   :  { %v108_v38 = vmul.f32 %v846_v34, %v106_v21  ;;  %v848_v44 = vpop.eup %847  ;;  %vm113_vm13 = vweird.f32 %v846_v34  ;;  %v293_v61 = vmax.f32 %v290_v52, %v1103_v57  ;;  %v425_v62 = vsub.f32 %v1054_v28, %v1175_v43 }
  0x28   :  { %v173_v51 = vmul.f32 %v848_v44, %v171_v24  ;;  %vm1111_vm15 = vmor %vm112_vm12, %vm113_vm13  ;;  %vm178_vm0 = vweird.f32 %v848_v44 }
  0x29   :  { %v109_v45 = vsub.f32 1.0, %v108_v38  ;;  %v296_v9 = vmax.f32 %v293_v61, %v1121_v1  ;;  %vm1134_vm2 = vmor %vm177_vm14, %vm178_vm0  ;;  %v260_v61 = vmax.f32 %v259_v53, 0.0  ;;  %vm140_vm0 = vcmp.gt.f32.partialorder %v1022_v18, 1.0 }
  0x2a   :  { %v174_v60 = vsub.f32 1.0, %v173_v51 }
  0x2b   :  { %v110_v54 = vmul.f32 %v846_v34, %v109_v45  ;;  %v1149_v24 = vmax.f32 %v296_v9, %v1141_v17  ;;  %v261_v9 = vmin.f32 %v260_v61, 7.99 }
  0x2c   :  { %v175_v3 = vmul.f32 %v848_v44, %v174_v60 }
  0x2d   :  { %v111_v0 = vadd.f32 %v846_v34, %v110_v54  ;;  %v300_v35 = vsub.f32 %v1037_v25, %v1149_v24  ;;  %v310_v36 = vsub.f32 %v1042_v6, %v1149_v24  ;;  %v330_v59 = vsub.f32 %v1067_v32, %v1149_v24 }
  0x2e   :  { %v176_v13 = vadd.f32 %v848_v44, %v175_v3  ;;  %v1205_v26 = vfloor.f32 %v261_v9  ;;  %v350_v53 = vsub.f32 %v1091_v48, %v1149_v24 }
  0x2f   :  { %v115_v11 = vsel %vm1111_vm15, %v846_v34, %v111_v0  ;;  %v301_v45 = vmul.f32 1.442695, %v300_v35  ;;  %v311_v47 = vmul.f32 1.442695, %v310_v36  ;;  %v340_v0 = vsub.f32 %v1079_v40, %v1149_v24 }
  0x30   :  { %v120_v21 = vsel %vm117_vm1, %v119_v50, %v115_v11  ;;  %v180_v34 = vsel %vm1134_vm2, %v848_v44, %v176_v13  ;;  %v320_v50 = vsub.f32 %v1049_v27, %v1149_v24  ;;  %v1208_v36 = vadd.f32 1e-07, %v1007_v39 }
  0x31   :  { %v1152_v30 = vmul.f32 %v120_v21, %v105_v63  ;;  %v185_v42 = vsel %vm182_vm3, %v184_v16, %v180_v34  ;;  %849 = vpow2.f32 %v301_v45  ;;  %v331_v63 = vmul.f32 1.442695, %v330_v59 }
  0x32   :  { %v1177_v44 = vmul.f32 %v185_v42, %v170_v14  ;;  %v321_v54 = vmul.f32 1.442695, %v320_v50  ;;  %851 = vpow2.f32 %v311_v47  ;;  %v426_v16 = vmul.f32 1.442695, %v425_v62 }
  0x33   :  { %v1172_v38 = vmul.f32 %v1152_v30, %v1152_v30  ;;  %v341_v34 = vmul.f32 1.442695, %v340_v0  ;;  %v1213_v47 = vmul.f32 0.25, %v1009_v46  ;;  %v435_v39 = vsub.f32 %v1059_v29, %v1175_v43 }
  0x34   :  { %v1184_v52 = vmul.f32 %v1177_v44, %v1177_v44  ;;  %853 = vpow2.f32 %v321_v54  ;;  %v268_v62 = vsub.f32 %v985_v8, %v1191_v55  ;;  %vm304_vm6 = vcmp.eq.f32.partialorder %v1205_v26, 0.0 }
  0x35   :  { %v123_v51 = vmul.f32 0.002785687, %v1172_v38  ;;  %855 = vpow2.f32 %v331_v63  ;;  %v360_v63 = vsub.f32 %v1103_v57, %v1149_v24  ;;  %vm314_vm7 = vcmp.eq.f32.partialorder %v1205_v26, 1.0 }
  0x36   :  { %v188_v60 = vmul.f32 0.002785687, %v1184_v52  ;;  %857 = vpow2.f32 %v426_v16  ;;  %vm324_vm9 = vcmp.eq.f32.partialorder %v1205_v26, 2.0  ;;  %vm334_vm10 = vcmp.eq.f32.partialorder %v1205_v26, 3.0 }
  0x37   :  { %v124_v56 = vadd.f32 -0.015866, %v123_v51  ;;  %v850_v14 = vpop.eup %849  ;;  %v1216_v51 = vadd.f32 1.0, %v1205_v26  ;;  %859 = vpow2.f32 %v341_v34  ;;  %vm344_vm12 = vcmp.eq.f32.partialorder %v1205_v26, 4.0 }
  0x38   :  { %v189_v3 = vadd.f32 -0.015866, %v188_v60  ;;  %v852_v21 = vpop.eup %851  ;;  %vm354_vm14 = vcmp.eq.f32.partialorder %v1205_v26, 5.0  ;;  %vm144_vm1 = vcmp.eq.f32.partialorder %v1018_v12, 0.0  ;;  %vm147_vm2 = vcmp.ne.f32.partialorder %v1018_v12, %v1018_v12 }
  0x39   :  { %v125_v4 = vmul.f32 %v124_v56, %v1172_v38  ;;  %v313_v45 = vadd.f32 %v852_v21, %v850_v14  ;;  %v1221_v56 = vmax.f32 %v262_v10, 0.0  ;;  %v1227_v46 = vsub.f32 %v1216_v51, %v261_v9 }
  0x3a   :  { %v190_v15 = vmul.f32 %v189_v3, %v1184_v52  ;;  %v854_v35 = vpop.eup %853  ;;  %vm305_vm4 = vcmp.eq.f32.partialorder %v1216_v51, 0.0  ;;  %vm315_vm5 = vcmp.eq.f32.partialorder %v1216_v51, 1.0  ;;  %vm325_vm8 = vcmp.eq.f32.partialorder %v1216_v51, 2.0 }
  0x3b   :  { %v126_v11 = vadd.f32 0.04247222, %v125_v4  ;;  %v323_v60 = vadd.f32 %v854_v35, %v313_v45  ;;  %v351_v4 = vmul.f32 1.442695, %v350_v53  ;;  %v856_v0 = vpop.eup %855  ;;  %v1234_v10 = vsub.f32 1.0, %v1227_v46 }
  0x3c   :  { %v191_v42 = vadd.f32 0.04247222, %v190_v15  ;;  %v1247_v21 = vpop.eup %857  ;;  %vm335_vm11 = vcmp.eq.f32.partialorder %v1216_v51, 3.0  ;;  %vm345_vm13 = vcmp.eq.f32.partialorder %v1216_v51, 4.0  ;;  %vm355_vm15 = vcmp.eq.f32.partialorder %v1216_v51, 5.0 }
  0x3d   :  { %v127_v13 = vmul.f32 %v126_v11, %v1172_v38  ;;  %v370_v11 = vsub.f32 %v1121_v1, %v1149_v24  ;;  %v306_v15 = vsel %vm305_vm4, %v1234_v10, 0.0  ;;  %v316_v16 = vsel %vm315_vm5, %v1234_v10, 0.0  ;;  %v860_v45 = vpop.eup %859 }
  0x3e   :  { %v192_v54 = vmul.f32 %v191_v42, %v1184_v52  ;;  %v307_v34 = vsel %vm304_vm6, %v1227_v46, %v306_v15  ;;  %v317_v35 = vsel %vm314_vm7, %v1227_v46, %v316_v16  ;;  %v333_v42 = vadd.f32 %v856_v0, %v323_v60 }
  0x3f   :  { %v128_v50 = vadd.f32 -0.074975304, %v127_v13  ;;  %v308_v53 = vmul.f32 %v307_v34, %v1037_v25  ;;  %v336_v0 = vsel %vm335_vm11, %v1234_v10, 0.0  ;;  %861 = vpow2.f32 %v351_v4 }
  0x40   :  { %v193_v61 = vadd.f32 -0.074975304, %v192_v54  ;;  %v318_v54 = vmul.f32 %v1042_v6, %v317_v35  ;;  %v343_v15 = vadd.f32 %v860_v45, %v333_v42  ;;  %863 = vrcp.f32 %v1208_v36 }
  0x41   :  { %v129_v59 = vmul.f32 %v128_v50, %v1172_v38  ;;  %vm364_vm3 = vcmp.eq.f32.partialorder %v1205_v26, 6.0  ;;  %vm365_vm4 = vcmp.eq.f32.partialorder %v1216_v51, 6.0  ;;  %vm205_vm5 = vcmp.gt.f32.partialorder %v1029_v22, 1.0 }
  0x42   :  { %v194_v9 = vmul.f32 %v193_v61, %v1184_v52  ;;  %v326_v61 = vsel %vm325_vm8, %v1234_v10, 0.0  ;;  %vm209_vm6 = vcmp.eq.f32.partialorder %v1025_v19, 0.0  ;;  %vm375_vm7 = vcmp.eq.f32.partialorder %v1216_v51, 7.0 }
  0x43   :  { %v130_v3 = vadd.f32 0.1064488, %v129_v59  ;;  %v327_v60 = vsel %vm324_vm9, %v1227_v46, %v326_v61  ;;  %v361_v61 = vmul.f32 1.442695, %v360_v63  ;;  %vm374_vm8 = vcmp.eq.f32.partialorder %v1205_v26, 7.0 }
  0x44   :  { %v195_v13 = vadd.f32 0.1064488, %v194_v9  ;;  %v319_v9 = vadd.f32 %v318_v54, %v308_v53  ;;  %v328_v6 = vmul.f32 %v1049_v27, %v327_v60  ;;  %v356_v54 = vsel %vm355_vm15, %v1234_v10, 0.0 }
  0x45   :  { %v131_v14 = vmul.f32 %v130_v3, %v1172_v38  ;;  %v357_v4 = vsel %vm354_vm14, %v1227_v46, %v356_v54  ;;  %865 = vpow2.f32 %v361_v61  ;;  %vm212_vm9 = vcmp.ne.f32.partialorder %v1025_v19, %v1025_v19 }
  0x46   :  { %v196_v59 = vmul.f32 %v195_v13, %v1184_v52  ;;  %v329_v35 = vadd.f32 %v328_v6, %v319_v9  ;;  %v358_v60 = vmul.f32 %v1091_v48, %v357_v4  ;;  %v152_v6 = vand.u32 2147483648, %v1018_v12 }
  0x47   :  { %v132_v50 = vadd.f32 -0.14207031, %v131_v14  ;;  %v337_v14 = vsel %vm334_vm10, %v1227_v46, %v336_v0  ;;  %v371_v0 = vmul.f32 1.442695, %v370_v11  ;;  %v380_v11 = vsub.f32 %v1141_v17, %v1149_v24 }
  0x48   :  { %v197_v25 = vadd.f32 -0.14207031, %v196_v59  ;;  %v338_v13 = vmul.f32 %v1067_v32, %v337_v14  ;;  %v366_v14 = vsel %vm365_vm4, %v1234_v10, 0.0  ;;  %vm385_vm10 = vcmp.eq.f32.partialorder %v1216_v51, 8.0 }
  0x49   :  { %v133_v3 = vmul.f32 %v132_v50, %v1172_v38  ;;  %v346_v50 = vsel %vm345_vm13, %v1234_v10, 0.0  ;;  %v367_v48 = vsel %vm364_vm3, %v1227_v46, %v366_v14  ;;  %867 = vpow2.f32 %v371_v0 }
  0x4a   :  { %v198_v34 = vmul.f32 %v197_v25, %v1184_v52  ;;  %v347_v27 = vsel %vm344_vm12, %v1227_v46, %v346_v50  ;;  %v339_v42 = vadd.f32 %v338_v13, %v329_v35  ;;  %v862_v25 = vpop.eup %861  ;;  %v264_v50 = vmin.f32 %v1221_v56, 7.99 }
  0x4b   :  { %v134_v16 = vadd.f32 0.19993454, %v133_v3  ;;  %v348_v45 = vmul.f32 %v1079_v40, %v347_v27  ;;  %v353_v13 = vadd.f32 %v862_v25, %v343_v15  ;;  %v368_v27 = vmul.f32 %v1103_v57, %v367_v48 }
  0x4c   :  { %v199_v32 = vadd.f32 0.19993454, %v198_v34  ;;  %v864_v34 = vpop.eup %863  ;;  %v381_v54 = vmul.f32 1.442695, %v380_v11  ;;  %v217_v57 = vand.u32 2147483648, %v1025_v19  ;;  %v250_v18 = vand.u32 2147483648, %v1208_v36 }
  0x4d   :  { %v135_v53 = vmul.f32 %v134_v16, %v1172_v38  ;;  %v349_v9 = vadd.f32 %v348_v45, %v339_v42  ;;  %v240_v42 = vmul.f32 %v864_v34, %v1208_v36  ;;  %v866_v15 = vpop.eup %865  ;;  %vm244_vm11 = vweird.f32 %v1208_v36 }
  0x4e   :  { %v200_v3 = vmul.f32 %v199_v32, %v1184_v52  ;;  %869 = vpow2.f32 %v381_v54  ;;  %vm245_vm12 = vweird.f32 %v864_v34  ;;  %v251_v12 = vor.u32 1.1754944e-38, %v250_v18 }
  0x4f   :  { %v136_v59 = vadd.f32 -0.33333147, %v135_v53  ;;  %v359_v53 = vadd.f32 %v358_v60, %v349_v9  ;;  %v241_v56 = vsub.f32 1.0, %v240_v42  ;;  %v868_v4 = vpop.eup %867  ;;  %vm246_vm13 = vmor %vm244_vm11, %vm245_vm12  ;;  %vm384_vm14 = vcmp.eq.f32.partialorder %v1205_v26, 8.0 }
  0x50   :  { %v201_v63 = vadd.f32 -0.33333147, %v200_v3 }
  0x51   :  { %v137_v40 = vmul.f32 %v136_v59, %v1172_v38  ;;  %v363_v59 = vadd.f32 %v866_v15, %v353_v13  ;;  %v1309_v3 = vadd.f32 %v368_v27, %v359_v53 }
  0x52   :  { %v202_v38 = vmul.f32 %v201_v63, %v1184_v52  ;;  %v376_v52 = vsel %vm375_vm7, %v1234_v10, 0.0  ;;  %v1323_v63 = vfloor.f32 %v264_v50 }
  0x53   :  { %v138_v16 = vmul.f32 %v137_v40, %v1152_v30  ;;  %v1312_v9 = vsel %vm374_vm8, %v1227_v46, %v376_v52  ;;  %v242_v40 = vmul.f32 %v864_v34, %v241_v56  ;;  %v373_v25 = vadd.f32 %v868_v4, %v363_v59 }
  0x54   :  { %v203_v32 = vmul.f32 %v202_v38, %v1177_v44  ;;  %v248_v38 = vand.u32 2147483647, %v1208_v36  ;;  %v1336_v22 = vadd.f32 1.0, %v1323_v63  ;;  %vm429_vm15 = vcmp.eq.f32.partialorder %v1323_v63, 0.0 }
  0x55   :  { %v139_v35 = vadd.f32 %v138_v16, %v1152_v30  ;;  %v243_v48 = vadd.f32 %v864_v34, %v242_v40  ;;  %v436_v36 = vmul.f32 1.442695, %v435_v39  ;;  %v445_v39 = vsub.f32 %v1072_v33, %v1175_v43 }
  0x56   :  { %v204_v30 = vadd.f32 %v203_v32, %v1177_v44  ;;  %v1317_v44 = vsel %vm385_vm10, %v1234_v10, 0.0  ;;  %v1343_v19 = vsub.f32 %v1336_v22, %v264_v50  ;;  %vm440_vm3 = vcmp.eq.f32.partialorder %v1336_v22, 1.0 }
  0x57   :  { %v141_v45 = vsub.f32 1.5707964, %v139_v35  ;;  %v247_v27 = vsel %vm246_vm13, %v864_v34, %v243_v48  ;;  %871 = vpow2.f32 %v436_v36  ;;  %vm449_vm4 = vcmp.eq.f32.partialorder %v1323_v63, 2.0 }
  0x58   :  { %v206_v51 = vsub.f32 1.5707964, %v204_v30  ;;  %v1351_v34 = vsub.f32 1.0, %v1343_v19  ;;  %v446_v54 = vmul.f32 1.442695, %v445_v39  ;;  %vm460_vm7 = vcmp.eq.f32.partialorder %v1336_v22, 3.0 }
  0x59   :  { %v142_v61 = vsel %vm140_vm0, %v141_v45, %v139_v35  ;;  %v870_v35 = vpop.eup %869  ;;  %vm249_vm0 = vcmp.eq.f32.partialorder %v248_v38, 8.507059e+37  ;;  %v387_v48 = vsel %vm384_vm14, %v1227_v46, %v1317_v44  ;;  %vm469_vm8 = vcmp.eq.f32.partialorder %v1323_v63, 4.0 }
  0x5a   :  { %v145_v60 = vsel %vm144_vm1, 0.0, %v142_v61  ;;  %v207_v16 = vsel %vm205_vm5, %v206_v51, %v204_v30  ;;  %v383_v32 = vadd.f32 %v870_v35, %v373_v25  ;;  %vm430_vm1 = vcmp.eq.f32.partialorder %v1336_v22, 0.0 }
  0x5b   :  { %v149_v0 = vsel %vm147_vm2, nan, %v145_v60  ;;  %v210_v10 = vsel %vm209_vm6, 0.0, %v207_v16  ;;  %vm439_vm2 = vcmp.eq.f32.partialorder %v1323_v63, 1.0  ;;  %vm450_vm5 = vcmp.eq.f32.partialorder %v1336_v22, 2.0 }
  0x5c   :  { %v151_v14 = vand.u32 2147483647, %v149_v0  ;;  %v214_v11 = vsel %vm212_vm9, nan, %v210_v10  ;;  %873 = vlog2.f32 %v383_v32  ;;  %v431_v15 = vsel %vm430_vm1, %v1351_v34, 0.0 }
  0x5d   :  { %v216_v53 = vand.u32 2147483647, %v214_v11  ;;  %v441_v45 = vsel %vm440_vm3, %v1351_v34, 0.0  ;;  %v451_v30 = vsel %vm450_vm5, %v1351_v34, 0.0  ;;  %v432_v56 = vsel %vm429_vm15, %v1343_v19, %v431_v15  ;;  %v872_v40 = vpop.eup %871 }
  0x5e   :  { %v153_v13 = vor.u32 %v152_v6, %v151_v14  ;;  %v252_v6 = vsel %vm249_vm0, %v251_v12, %v247_v27  ;;  %v442_v59 = vsel %vm439_vm2, %v1343_v19, %v441_v45  ;;  %v452_v4 = vsel %vm449_vm4, %v1343_v19, %v451_v30 }
  0x5f   :  { %v218_v42 = vor.u32 %v217_v57, %v216_v53  ;;  %v1347_v52 = vmul.f32 %v252_v6, %v1213_v47  ;;  %v455_v47 = vsub.f32 %v1084_v41, %v1175_v43  ;;  %v433_v61 = vmul.f32 %v1054_v28, %v432_v56 }
  0x60   :  { %v443_v60 = vmul.f32 %v1059_v29, %v442_v59  ;;  %875 = vpow2.f32 %v446_v54  ;;  %v453_v51 = vmul.f32 %v1072_v33, %v452_v4  ;;  %vm459_vm6 = vcmp.eq.f32.partialorder %v1323_v63, 3.0 }
  0x61   :  { %v219_v50 = vsub.f32 %v153_v13, %v218_v42  ;;  %v456_v18 = vmul.f32 1.442695, %v455_v47  ;;  %v378_v14 = vmul.f32 %v1121_v1, %v1312_v9  ;;  %v461_v28 = vsel %vm460_vm7, %v1351_v34, 0.0 }
  0x62   :  { %v874_v25 = vpop.eup %873  ;;  %v444_v16 = vadd.f32 %v443_v60, %v433_v61  ;;  %v465_v29 = vsub.f32 %v1096_v49, %v1175_v43  ;;  %v462_v10 = vsel %vm459_vm6, %v1343_v19, %v461_v28  ;;  %v438_v38 = vadd.f32 %v872_v40, %v1247_v21 }
  0x63   :  { %v220_v57 = vmul.f32 %v219_v50, %v219_v50  ;;  %877 = vpow2.f32 %v456_v18  ;;  %v463_v9 = vmul.f32 %v1084_v41, %v462_v10  ;;  %vm470_vm9 = vcmp.eq.f32.partialorder %v1336_v22, 4.0  ;;  %v1446_v10 = vld [vmem:[%s1770_s1 + $0xa0] sm:$0xff] }
  0x64   :  { %v454_v1 = vadd.f32 %v453_v51, %v444_v16  ;;  %v466_v12 = vmul.f32 1.442695, %v465_v29  ;;  %v475_v11 = vsub.f32 %v1108_v58, %v1175_v43  ;;  %v471_v26 = vsel %vm470_vm9, %v1351_v34, 0.0 }
  0x65   :  { %v1371_v0 = vmul.f32 0.40528473, %v220_v57  ;;  %v1397_v46 = vmax.f32 %v265_v5, 0.0  ;;  %v379_v41 = vadd.f32 %v378_v14, %v1309_v3  ;;  %v388_v21 = vmul.f32 %v1141_v17, %v387_v48 }
  0x66   :  { %v876_v35 = vpop.eup %875  ;;  %879 = vpow2.f32 %v466_v12  ;;  %v391_v44 = vmul.f32 0.6931472, %v874_v25  ;;  %v472_v27 = vsel %vm469_vm8, %v1343_v19, %v471_v26  ;;  %v476_v36 = vmul.f32 1.442695, %v475_v11  ;;  %v1431_v25 = vld [vmem:[%s1770_s1 + $0x90] sm:$0xff] }
  0x67   :  { %v222_v33 = vsub.f32 %v1371_v0, %v1031_v23  ;;  %v448_v53 = vadd.f32 %v876_v35, %v438_v38  ;;  %v464_v32 = vadd.f32 %v463_v9, %v454_v1  ;;  %v473_v42 = vmul.f32 %v1096_v49, %v472_v27  ;;  %v1478_v27 = vld [vmem:[%s1770_s1 + $0xb0] sm:$0xff] }
  0x68   :  { %vm479_vm10 = vcmp.eq.f32.partialorder %v1323_v63, 5.0  ;;  %vm480_vm11 = vcmp.eq.f32.partialorder %v1336_v22, 5.0  ;;  %v485_v17 = vsub.f32 %v1126_v2, %v1175_v43  ;;  %v267_v5 = vmin.f32 %v1397_v46, 7.99  ;;  %v1462_v46 = vld [vmem:[%s1770_s1 + $0xa8] sm:$0xff] }
  0x69   :  { %v223_v13 = vadd.f32 1.0000001, %v222_v33  ;;  %v878_v6 = vpop.eup %877  ;;  %v481_v37 = vsel %vm480_vm11, %v1351_v34, 0.0  ;;  %v1409_v3 = vadd.f32 %v388_v21, %v379_v41  ;;  %vm490_vm12 = vcmp.eq.f32.partialorder %v1336_v22, 6.0 }
  0x6a   :  { %v458_v7 = vadd.f32 %v878_v6, %v448_v53  ;;  %v482_v49 = vsel %vm479_vm10, %v1343_v19, %v481_v37  ;;  %v486_v47 = vmul.f32 1.442695, %v485_v17  ;;  %v495_v15 = vsub.f32 %v1146_v20, %v1175_v43  ;;  %v1493_v37 = vld [vmem:[%s1770_s1 + $0xb8] sm:$0xff] }
  0x6b   :  { %881 = vrcp.f32 %v223_v13  ;;  %v233_v50 = vand.u32 2147483647, %v223_v13  ;;  %v235_v54 = vand.u32 2147483648, %v223_v13  ;;  %v1416_v30 = vadd.f32 %v391_v44, %v1149_v24  ;;  %v1537_v24 = vld [vmem:[%s1769_s0 + $0x50] sm:$0xff] }
  0x6c   :  { %883 = vpow2.f32 %v476_v36  ;;  %v880_v39 = vpop.eup %879  ;;  %v474_v56 = vadd.f32 %v473_v42, %v464_v32  ;;  %vm489_vm13 = vcmp.eq.f32.partialorder %v1323_v63, 6.0  ;;  %v491_v4 = vsel %vm490_vm12, %v1351_v34, 0.0 }
  0x6d   :  { %v468_v57 = vadd.f32 %v880_v39, %v458_v7  ;;  %885 = vpow2.f32 %v486_v47  ;;  %v483_v61 = vmul.f32 %v1108_v58, %v482_v49  ;;  %v496_v60 = vmul.f32 1.442695, %v495_v15  ;;  %v1436_v58 = vld [vmem:[%s1770_s1 + $0x98] sm:$0xff]  ;;  %v1506_v15 = vld [vmem:[%s1770_s1 + $0xc0] sm:$0xff] }
  0x6e   :  { %vm500_vm14 = vcmp.eq.f32.partialorder %v1336_v22, 7.0  ;;  %v505_v51 = vsub.f32 %v1157_v31, %v1175_v43  ;;  %vm229_vm15 = vweird.f32 %v223_v13  ;;  %vm1424_vm1 = vcmp.eq.f32.partialorder %v233_v50, 8.507059e+37 }
  0x6f   :  { %v492_v16 = vsel %vm489_vm13, %v1343_v19, %v491_v4  ;;  %887 = vpow2.f32 %v496_v60  ;;  %vm499_vm2 = vcmp.eq.f32.partialorder %v1323_v63, 7.0  ;;  %v501_v29 = vsel %vm500_vm14, %v1351_v34, 0.0 }
  0x70   :  { %v506_v33 = vmul.f32 1.442695, %v505_v51  ;;  %v1441_v48 = vfloor.f32 %v267_v5  ;;  %v236_v1 = vor.u32 1.1754944e-38, %v235_v54  ;;  %v484_v9 = vadd.f32 %v483_v61, %v474_v56 }
  0x71   :  { %v882_v45 = vpop.eup %881  ;;  %vm510_vm4 = vcmp.eq.f32.partialorder %v1336_v22, 8.0  ;;  %v528_v12 = vmax.f32 %v1431_v25, %v1436_v58  ;;  %v493_v35 = vmul.f32 %v1126_v2, %v492_v16  ;;  %v502_v22 = vsel %vm499_vm2, %v1343_v19, %v501_v29 }
  0x72   :  { %v225_v59 = vmul.f32 %v882_v45, %v223_v13  ;;  %v884_v40 = vpop.eup %883  ;;  %vm230_vm0 = vweird.f32 %v882_v45  ;;  %889 = vpow2.f32 %v506_v33  ;;  %v1457_v26 = vadd.f32 1.0, %v1441_v48 }
  0x73   :  { %v478_v14 = vadd.f32 %v884_v40, %v468_v57  ;;  %vm1448_vm3 = vmor %vm229_vm15, %vm230_vm0  ;;  %v886_v13 = vpop.eup %885  ;;  %vm509_vm5 = vcmp.eq.f32.partialorder %v1323_v63, 8.0  ;;  %v531_v21 = vmax.f32 %v528_v12, %v1446_v10  ;;  %v511_v44 = vsel %vm510_vm4, %v1351_v34, 0.0 }
  0x74   :  { %v226_v18 = vsub.f32 1.0, %v225_v59  ;;  %v1473_v53 = vsub.f32 %v1457_v26, %v267_v5  ;;  %vm554_vm6 = vcmp.eq.f32.partialorder %v1441_v48, 0.0  ;;  %vm555_vm7 = vcmp.eq.f32.partialorder %v1457_v26, 0.0 }
  0x75   :  { %v488_v41 = vadd.f32 %v886_v13, %v478_v14  ;;  %v888_v36 = vpop.eup %887  ;;  %v534_v32 = vmax.f32 %v531_v21, %v1462_v46  ;;  %vm565_vm8 = vcmp.eq.f32.partialorder %v1457_v26, 1.0  ;;  %vm564_vm9 = vcmp.eq.f32.partialorder %v1441_v48, 1.0 }
  0x76   :  { %v227_v28 = vmul.f32 %v882_v45, %v226_v18  ;;  %v1488_v7 = vsub.f32 1.0, %v1473_v53  ;;  %v494_v17 = vadd.f32 %v493_v35, %v484_v9  ;;  %v503_v5 = vmul.f32 %v1146_v20, %v502_v22 }
  0x77   :  { %v498_v42 = vadd.f32 %v888_v36, %v488_v41  ;;  %v537_v39 = vmax.f32 %v534_v32, %v1478_v27  ;;  %vm575_vm10 = vcmp.eq.f32.partialorder %v1457_v26, 2.0  ;;  %v512_v47 = vsel %vm509_vm5, %v1343_v19, %v511_v44  ;;  %v1519_v19 = vld [vmem:[%s1770_s1 + $0xc8] sm:$0xff]  ;;  %v1582_v36 = vld [vmem:[%s1770_s1 + $0xd8] sm:$0xff] }
  0x78   :  { %v228_v11 = vadd.f32 %v882_v45, %v227_v28  ;;  %v890_v50 = vpop.eup %889  ;;  %v566_v20 = vsel %vm565_vm8, %v1488_v7, 0.0  ;;  %vm574_vm11 = vcmp.eq.f32.partialorder %v1441_v48, 2.0  ;;  %v576_v59 = vsel %vm575_vm10, %v1488_v7, 0.0 }
  0x79   :  { %v508_v54 = vadd.f32 %v890_v50, %v498_v42  ;;  %v540_v57 = vmax.f32 %v537_v39, %v1493_v37  ;;  %v567_v56 = vsel %vm564_vm9, %v1473_v53, %v566_v20  ;;  %vm585_vm12 = vcmp.eq.f32.partialorder %v1457_v26, 3.0 }
  0x7a   :  { %v232_v2 = vsel %vm1448_vm3, %v882_v45, %v228_v11  ;;  %v556_v45 = vsel %vm555_vm7, %v1488_v7, 0.0  ;;  %v504_v4 = vadd.f32 %v503_v5, %v494_v17  ;;  %v513_v61 = vmul.f32 %v1157_v31, %v512_v47 }
  0x7b   :  { %v237_v6 = vsel %vm1424_vm1, %v236_v1, %v232_v2  ;;  %891 = vlog2.f32 %v508_v54  ;;  %v543_v60 = vmax.f32 %v540_v57, %v1506_v15  ;;  %v568_v18 = vmul.f32 %v1436_v58, %v567_v56  ;;  %v1613_v57 = vld [vmem:[%s1770_s1 + $0xe8] sm:$0xff] }
  0x7c   :  { %v238_v34 = vmul.f32 %v237_v6, %v1371_v0  ;;  %v577_v14 = vsel %vm574_vm11, %v1473_v53, %v576_v59  ;;  %vm584_vm13 = vcmp.eq.f32.partialorder %v1441_v48, 3.0  ;;  %v1546_v28 = vmax.f32 %v268_v62, 0.0  ;;  %v1587_v6 = vld [vmem:[%s1770_s1 + $0xe0] sm:$0xff] }
  0x7d   :  { %v546_v31 = vmax.f32 %v543_v60, %v1519_v19  ;;  %v394_v29 = vsub.f32 %v1416_v30, %v1409_v3  ;;  %v1550_v33 = vadd.f32 %v513_v61, %v504_v4  ;;  %vm594_vm14 = vcmp.eq.f32.partialorder %v1441_v48, 4.0 }
  0x7e   :  { %v254_v49 = vmul.f32 %v238_v34, %v1371_v0  ;;  %v557_v0 = vsel %vm554_vm6, %v1473_v53, %v556_v45  ;;  %vm595_vm15 = vcmp.eq.f32.partialorder %v1457_v26, 4.0  ;;  %v578_v8 = vmul.f32 %v1446_v10, %v577_v14 }
  0x7f   :  { %v558_v40 = vmul.f32 %v1431_v25, %v557_v0  ;;  %v596_v41 = vsel %vm595_vm15, %v1488_v7, 0.0  ;;  %vm605_vm0 = vcmp.eq.f32.partialorder %v1457_v26, 5.0  ;;  %vm604_vm1 = vcmp.eq.f32.partialorder %v1441_v48, 5.0 }
  0x80   :  { %v255_v63 = vadd.f32 %v254_v49, %v1347_v52  ;;  %v1530_v52 = vld [vmem:[%s1770_s1 + $0xd0] sm:$0xff]  ;;  %v606_v32 = vsel %vm605_vm0, %v1488_v7, 0.0  ;;  %v270_v5 = vmin.f32 %v1546_v28, 7.99  ;;  %vm615_vm2 = vcmp.eq.f32.partialorder %v1457_v26, 6.0 }
  0x81   :  { %v1553_v38 = vmax.f32 %v546_v31, %v1530_v52  ;;  %v569_v9 = vadd.f32 %v568_v18, %v558_v40  ;;  %v892_v62 = vpop.eup %891  ;;  %v653_v39 = vmax.f32 %v1582_v36, %v1587_v6  ;;  %v607_v54 = vsel %vm604_vm1, %v1473_v53, %v606_v32 }
  0x82   :  { %v256_v51 = vsub.f32 %v1031_v23, %v255_v63  ;;  %v586_v23 = vsel %vm585_vm12, %v1488_v7, 0.0  ;;  %v516_v11 = vmul.f32 0.6931472, %v892_v62  ;;  %vm614_vm3 = vcmp.eq.f32.partialorder %v1441_v48, 6.0 }
  0x83   :  { %v587_v55 = vsel %vm584_vm13, %v1473_v53, %v586_v23  ;;  %v550_v3 = vsub.f32 %v1431_v25, %v1553_v38  ;;  %v560_v30 = vsub.f32 %v1436_v58, %v1553_v38  ;;  %v570_v12 = vsub.f32 %v1446_v10, %v1553_v38 }
  0x84   :  { %v257_v16 = vsub.f32 1.0, %v256_v51  ;;  %v580_v13 = vsub.f32 %v1462_v46, %v1553_v38  ;;  %v590_v35 = vsub.f32 %v1478_v27, %v1553_v38  ;;  %v588_v2 = vmul.f32 %v1462_v46, %v587_v55 }
  0x85   :  { %v551_v22 = vmul.f32 1.442695, %v550_v3  ;;  %v561_v21 = vmul.f32 1.442695, %v560_v30  ;;  %v571_v25 = vmul.f32 1.442695, %v570_v12  ;;  %v517_v58 = vadd.f32 %v516_v11, %v1175_v43 }
  0x86   :  { %v1558_v1 = vmul.f32 %v1537_v24, %v257_v16  ;;  %v581_v44 = vmul.f32 1.442695, %v580_v13  ;;  %v600_v10 = vsub.f32 %v1493_v37, %v1553_v38  ;;  %v579_v46 = vadd.f32 %v578_v8, %v569_v9  ;;  %v1633_v16 = vld [vmem:[%s1770_s1 + $0xf8] sm:$0xff] }
  0x87   :  { %893 = vpow2.f32 %v551_v22  ;;  %v597_v43 = vsel %vm594_vm14, %v1473_v53, %v596_v41  ;;  %v1593_v34 = vadd.f32 %v517_v58, %v394_v29  ;;  %v591_v42 = vmul.f32 1.442695, %v590_v35  ;;  %v1653_v35 = vld [vmem:[%s1770_s1 + $0x108] sm:$0xff] }
  0x88   :  { %895 = vpow2.f32 %v561_v21  ;;  %v610_v17 = vsub.f32 %v1506_v15, %v1553_v38  ;;  %v601_v49 = vmul.f32 1.442695, %v600_v10  ;;  %v620_v47 = vsub.f32 %v1519_v19, %v1553_v38 }
  0x89   :  { %897 = vpow2.f32 %v571_v25  ;;  %v519_v50 = vsub.f32 %v1593_v34, %v1550_v33  ;;  %v589_v45 = vadd.f32 %v588_v2, %v579_v46  ;;  %v598_v20 = vmul.f32 %v1478_v27, %v597_v43  ;;  %v1621_v27 = vld [vmem:[%s1770_s1 + $0xf0] sm:$0xff]  ;;  %v1672_v43 = vld [vmem:[%s1770_s1 + $0x118] sm:$0xff] }
  0x8a   :  { %899 = vpow2.f32 %v581_v44  ;;  %v611_v0 = vmul.f32 1.442695, %v610_v17  ;;  %v616_v56 = vsel %vm615_vm2, %v1488_v7, 0.0  ;;  %v630_v63 = vsub.f32 %v1530_v52, %v1553_v38 }
  0x8b   :  { %901 = vpow2.f32 %v591_v42  ;;  %v621_v61 = vmul.f32 1.442695, %v620_v47  ;;  %v1623_v60 = vfloor.f32 %v270_v5  ;;  %v656_v51 = vmax.f32 %v653_v39, %v1613_v57 }
  0x8c   :  { %903 = vpow2.f32 %v601_v49  ;;  %v599_v31 = vadd.f32 %v598_v20, %v589_v45  ;;  %v608_v14 = vmul.f32 %v1493_v37, %v607_v54  ;;  %v617_v23 = vsel %vm614_vm3, %v1473_v53, %v616_v56  ;;  %v1643_v37 = vld [vmem:[%s1770_s1 + $0x100] sm:$0xff] }
  0x8d   :  { %v894_v59 = vpop.eup %893  ;;  %905 = vpow2.f32 %v611_v0  ;;  %v631_v29 = vmul.f32 1.442695, %v630_v63  ;;  %v1636_v9 = vadd.f32 1.0, %v1623_v60  ;;  %v659_v8 = vmax.f32 %v656_v51, %v1621_v27 }
  0x8e   :  { %v896_v4 = vpop.eup %895  ;;  %vm625_vm4 = vcmp.eq.f32.partialorder %v1457_v26, 7.0  ;;  %907 = vpow2.f32 %v621_v61  ;;  %v609_v13 = vadd.f32 %v608_v14, %v599_v31  ;;  %v618_v11 = vmul.f32 %v1506_v15, %v617_v23  ;;  %v1664_v15 = vld [vmem:[%s1770_s1 + $0x110] sm:$0xff] }
  0x8f   :  { %v898_v40 = vpop.eup %897  ;;  %v563_v18 = vadd.f32 %v896_v4, %v894_v59  ;;  %v1646_v3 = vsub.f32 %v1636_v9, %v270_v5  ;;  %v662_v30 = vmax.f32 %v659_v8, %v1633_v16  ;;  %vm624_vm5 = vcmp.eq.f32.partialorder %v1441_v48, 7.0 }
  0x90   :  { %v900_v28 = vpop.eup %899  ;;  %v626_v22 = vsel %vm625_vm4, %v1488_v7, 0.0  ;;  %909 = vpow2.f32 %v631_v29  ;;  %vm680_vm6 = vcmp.eq.f32.partialorder %v1636_v9, 0.0  ;;  %vm690_vm7 = vcmp.eq.f32.partialorder %v1636_v9, 1.0 }
  0x91   :  { %v573_v55 = vadd.f32 %v898_v40, %v563_v18  ;;  %v902_v62 = vpop.eup %901  ;;  %v665_v21 = vmax.f32 %v662_v30, %v1643_v37  ;;  %v1659_v2 = vsub.f32 1.0, %v1646_v3  ;;  %v627_v46 = vsel %vm624_vm5, %v1473_v53, %v626_v22 }
  0x92   :  { %v904_v41 = vpop.eup %903  ;;  %v619_v42 = vadd.f32 %v618_v11, %v609_v13  ;;  %vm635_vm8 = vcmp.eq.f32.partialorder %v1457_v26, 8.0  ;;  %vm700_vm9 = vcmp.eq.f32.partialorder %v1636_v9, 2.0  ;;  %vm634_vm10 = vcmp.eq.f32.partialorder %v1441_v48, 8.0 }
  0x93   :  { %v583_v12 = vadd.f32 %v900_v28, %v573_v55  ;;  %v906_v58 = vpop.eup %905  ;;  %v668_v44 = vmax.f32 %v665_v21, %v1653_v35  ;;  %vm679_vm11 = vcmp.eq.f32.partialorder %v1623_v60, 0.0  ;;  %v681_v39 = vsel %vm680_vm6, %v1659_v2, 0.0 }
  0x94   :  { %v908_v32 = vpop.eup %907  ;;  %v628_v47 = vmul.f32 %v1519_v19, %v627_v46  ;;  %vm689_vm12 = vcmp.eq.f32.partialorder %v1623_v60, 1.0  ;;  %v691_v26 = vsel %vm690_vm7, %v1659_v2, 0.0  ;;  %v636_v54 = vsel %vm635_vm8, %v1488_v7, 0.0 }
  0x95   :  { %v593_v25 = vadd.f32 %v902_v62, %v583_v12  ;;  %v671_v17 = vmax.f32 %v668_v44, %v1664_v15  ;;  %vm699_vm13 = vcmp.eq.f32.partialorder %v1623_v60, 2.0  ;;  %v701_v0 = vsel %vm700_vm9, %v1659_v2, 0.0 }
  0x96   :  { %v910_v49 = vpop.eup %909  ;;  %v682_v63 = vsel %vm679_vm11, %v1646_v3, %v681_v39  ;;  %v692_v61 = vsel %vm689_vm12, %v1646_v3, %v691_v26  ;;  %v637_v40 = vsel %vm634_vm10, %v1473_v53, %v636_v54  ;;  %vm710_vm14 = vcmp.eq.f32.partialorder %v1636_v9, 3.0 }
  0x97   :  { %v603_v10 = vadd.f32 %v904_v41, %v593_v25  ;;  %v1683_v45 = vmax.f32 %v671_v17, %v1672_v43  ;;  %v629_v29 = vadd.f32 %v628_v47, %v619_v42  ;;  %v683_v8 = vmul.f32 %v1582_v36, %v682_v63 }
  0x98   :  { %v693_v55 = vmul.f32 %v1587_v6, %v692_v61  ;;  %v702_v48 = vsel %vm699_vm13, %v1646_v3, %v701_v0  ;;  %v638_v30 = vmul.f32 %v1530_v52, %v637_v40  ;;  %vm709_vm15 = vcmp.eq.f32.partialorder %v1623_v60, 3.0 }
  0x99   :  { %v613_v5 = vadd.f32 %v906_v58, %v603_v10  ;;  %v675_v56 = vsub.f32 %v1582_v36, %v1683_v45  ;;  %v685_v19 = vsub.f32 %v1587_v6, %v1683_v45  ;;  %v695_v59 = vsub.f32 %v1613_v57, %v1683_v45 }
  0x9a   :  { %v705_v7 = vsub.f32 %v1621_v27, %v1683_v45  ;;  %v715_v51 = vsub.f32 %v1633_v16, %v1683_v45  ;;  %v725_v28 = vsub.f32 %v1643_v37, %v1683_v45  ;;  %v735_v62 = vsub.f32 %v1653_v35, %v1683_v45 }
  0x9b   :  { %v623_v20 = vadd.f32 %v908_v32, %v613_v5  ;;  %v676_v18 = vmul.f32 1.442695, %v675_v56  ;;  %v686_v31 = vmul.f32 1.442695, %v685_v19  ;;  %v696_v14 = vmul.f32 1.442695, %v695_v59 }
  0x9c   :  { %v706_v23 = vmul.f32 1.442695, %v705_v7  ;;  %v716_v53 = vmul.f32 1.442695, %v715_v51  ;;  %v711_v12 = vsel %vm710_vm14, %v1659_v2, 0.0  ;;  %v745_v6 = vsub.f32 %v1664_v15, %v1683_v45 }
  0x9d   :  { %v633_v4 = vadd.f32 %v910_v49, %v623_v20  ;;  %v726_v36 = vmul.f32 1.442695, %v725_v28  ;;  %v694_v13 = vadd.f32 %v693_v55, %v683_v8  ;;  %v703_v11 = vmul.f32 %v1613_v57, %v702_v48 }
  0x9e   :  { %vm720_vm0 = vcmp.eq.f32.partialorder %v1636_v9, 4.0  ;;  %v712_v22 = vsel %vm709_vm15, %v1646_v3, %v711_v12  ;;  %v736_v52 = vmul.f32 1.442695, %v735_v62  ;;  %v755_v21 = vsub.f32 %v1672_v43, %v1683_v45 }
  0x9f   :  { %911 = vlog2.f32 %v633_v4  ;;  %v1725_v58 = vadd.f32 %v638_v30, %v629_v29  ;;  %vm719_vm1 = vcmp.eq.f32.partialorder %v1623_v60, 4.0  ;;  %v721_v46 = vsel %vm720_vm0, %v1659_v2, 0.0 }
  0xa0   :  { %913 = vpow2.f32 %v676_v18  ;;  %v746_v57 = vmul.f32 1.442695, %v745_v6  ;;  %v771_v32 = vrot.slane %v1558_v1, 4  ;;  %v713_v39 = vmul.f32 %v1621_v27, %v712_v22 }
  0xa1   :  { %915 = vpow2.f32 %v686_v31  ;;  %vm730_vm2 = vcmp.eq.f32.partialorder %v1636_v9, 5.0  ;;  %v704_v47 = vadd.f32 %v703_v11, %v694_v13  ;;  %v756_v26 = vmul.f32 1.442695, %v755_v21 }
  0xa2   :  { %917 = vpow2.f32 %v696_v14  ;;  %v772_v20 = vadd.f32 %v771_v32, %v1558_v1  ;;  %vm729_vm3 = vcmp.eq.f32.partialorder %v1623_v60, 5.0  ;;  %v731_v27 = vsel %vm730_vm2, %v1659_v2, 0.0 }
  0xa3   :  { %919 = vpow2.f32 %v706_v23  ;;  %vm740_vm4 = vcmp.eq.f32.partialorder %v1636_v9, 6.0  ;;  %v714_v33 = vadd.f32 %v713_v39, %v704_v47  ;;  %v732_v61 = vsel %vm729_vm3, %v1646_v3, %v731_v27 }
  0xa4   :  { %921 = vpow2.f32 %v716_v53  ;;  %v773_v63 = vrot.slane %v772_v20, 2  ;;  %vm739_vm5 = vcmp.eq.f32.partialorder %v1623_v60, 6.0  ;;  %v741_v51 = vsel %vm740_vm4, %v1659_v2, 0.0 }
  0xa5   :  { %v912_v41 = vpop.eup %911  ;;  %923 = vpow2.f32 %v726_v36  ;;  %vm750_vm6 = vcmp.eq.f32.partialorder %v1636_v9, 7.0  ;;  %v733_v23 = vmul.f32 %v1643_v37, %v732_v61  ;;  %v742_v29 = vsel %vm739_vm5, %v1646_v3, %v741_v51 }
  0xa6   :  { %v914_v25 = vpop.eup %913  ;;  %v641_v44 = vmul.f32 0.6931472, %v912_v41  ;;  %925 = vpow2.f32 %v736_v52  ;;  %vm749_vm7 = vcmp.eq.f32.partialorder %v1623_v60, 7.0  ;;  %v751_v55 = vsel %vm750_vm6, %v1659_v2, 0.0 }
  0xa7   :  { %v916_v10 = vpop.eup %915  ;;  %927 = vpow2.f32 %v746_v57  ;;  %vm760_vm8 = vcmp.eq.f32.partialorder %v1636_v9, 8.0  ;;  %v743_v62 = vmul.f32 %v1653_v35, %v742_v29  ;;  %v752_v37 = vsel %vm749_vm7, %v1646_v3, %v751_v55 }
  0xa8   :  { %v918_v42 = vpop.eup %917  ;;  %v642_v17 = vadd.f32 %v641_v44, %v1553_v38  ;;  %v688_v5 = vadd.f32 %v916_v10, %v914_v25  ;;  %v722_v38 = vsel %vm719_vm1, %v1646_v3, %v721_v46  ;;  %929 = vpow2.f32 %v756_v26 }
  0xa9   :  { %v920_v49 = vpop.eup %919  ;;  %v723_v34 = vmul.f32 %v1633_v16, %v722_v38  ;;  %vm759_vm9 = vcmp.eq.f32.partialorder %v1623_v60, 8.0  ;;  %v761_v12 = vsel %vm760_vm8, %v1659_v2, 0.0  ;;  %v753_v6 = vmul.f32 %v1664_v15, %v752_v37 }
  0xaa   :  { %v643_v54 = vadd.f32 %v642_v17, %v519_v50  ;;  %v698_v0 = vadd.f32 %v918_v42, %v688_v5  ;;  %v922_v56 = vpop.eup %921  ;;  %v774_v50 = vadd.f32 %v773_v63, %v772_v20  ;;  %v762_v13 = vsel %vm759_vm9, %v1646_v3, %v761_v12 }
  0xab   :  { %v924_v1 = vpop.eup %923  ;;  %v724_v14 = vadd.f32 %v723_v34, %v714_v33  ;;  %v763_v41 = vmul.f32 %v1672_v43, %v762_v13 }
  0xac   :  { %v644_v19 = vsub.f32 %v643_v54, %v1725_v58  ;;  %v708_v59 = vadd.f32 %v920_v49, %v698_v0  ;;  %v926_v7 = vpop.eup %925  ;;  %v775_v40 = vrot.slane %v774_v50, 1 }
  0xad   :  { %v928_v31 = vpop.eup %927  ;;  %v734_v53 = vadd.f32 %v733_v23, %v724_v14 }
  0xae   :  { %v718_v4 = vadd.f32 %v922_v56, %v708_v59  ;;  %v776_v28 = vadd.f32 %v775_v40, %v774_v50  ;;  %v930_v8 = vpop.eup %929 }
  0xaf   :  { %v744_v36 = vadd.f32 %v743_v62, %v734_v53 }
  0xb0   :  { %v728_v18 = vadd.f32 %v924_v1, %v718_v4  ;;  %777 = vst [vmem:[%s1771_s2] sm:$0x1] %v776_v28 }
  0xb1   :  { %v754_v11 = vadd.f32 %v753_v6, %v744_v36 }
  0xb2   :  { %v738_v16 = vadd.f32 %v926_v7, %v728_v18 }
  0xb3   :  { %v764_v52 = vadd.f32 %v763_v41, %v754_v11 }
  0xb4   :  { %v748_v48 = vadd.f32 %v928_v31, %v738_v16 }
  0xb6   :  { %v758_v30 = vadd.f32 %v930_v8, %v748_v48 }
  0xb8   :  { %931 = vlog2.f32 %v758_v30 }
  0xbe   :  { %v932_v9 = vpop.eup %931 }
  0xbf   :  { %v766_v22 = vmul.f32 0.6931472, %v932_v9 }
  0xc1   :  { %v767_v35 = vadd.f32 %v766_v22, %v1683_v45 }
  0xc3   :  { %v768_v21 = vadd.f32 %v767_v35, %v644_v19 }
  0xc5   :  { %v769_v25 = vsub.f32 %v768_v21, %v764_v52 }
  0xc7   :  { %v770_v58 = vmul.f32 0.25, %v769_v25 }
  0xc9   :  { %v778_v60 = vmul.f32 %v1537_v24, %v770_v58 }
  0xcb   :  { %v779_v2 = vrot.slane %v778_v60, 4 }
  0xcd   :  { %v780_v44 = vadd.f32 %v779_v2, %v778_v60 }
  0xcf   :  { %v781_v10 = vrot.slane %v780_v44, 2 }
  0xd1   :  { %v782_v46 = vadd.f32 %v781_v10, %v780_v44 }
  0xd3   :  { %v783_v15 = vrot.slane %v782_v46, 1 }
  0xd5   :  { %v784_v57 = vadd.f32 %v783_v15, %v782_v46 }
  0xd7   :  { %785 = vst [vmem:[%s1772_s3] sm:$0x1] %v784_v57 }

</bundles_post_ra>
